<compile_context>
chip_gen: v5e
topology: v5e:2x2
jax: 0.10.0
libtpu: 0.0.40
codegen_flags: <defaults>
</compile_context>

<pallas_src>
import functools

import jax
import jax.numpy as jnp
from jax.experimental import pallas as pl
from jax.experimental.pallas import tpu as pltpu  # noqa: F401  (kept for the streaming TODO)


# -----------------------------------------------------------------------------
# Pallas kernel: grid-less, whole stack resident in VMEM, in-kernel layer loop
# -----------------------------------------------------------------------------
def _rwkv_stack_kernel(
    x_ref,        # (1, D)       f32  incoming hidden vector
    vecs_ref,     # (L, 11, D)   f32  packed per-layer vector params
    st_ref,       # (L, 4, D)    f32  packed incoming state rows [a, b, c, d]
    key_w_ref,    # (L, D, 3D)   bf16 fused [kk^T | vv^T | -rr^T]
    out_w_ref,    # (L, D, D)    bf16 outputv^T
    ffn_w_ref,    # (L, D, H+D)  bf16 fused [key_ffn^T | receptance_ffn^T]
    vffn_w_ref,   # (L, H, D)    bf16 value_ffn^T
    x_out_ref,    # (1, D)       f32  outgoing hidden vector
    st_out_ref,   # (L, 4, D)    f32  packed new state rows [a, b, c, d]
):
    n_layers, _, D = vecs_ref.shape
    H = vffn_w_ref.shape[1]

    def layernorm(v, w, b):
        mean = jnp.mean(v, axis=-1, keepdims=True)
        cen = v - mean
        var = jnp.mean(cen * cen, axis=-1, keepdims=True)
        return cen * jax.lax.rsqrt(var + 1e-5) * w + b

    x = x_out_ref  # placeholder to keep linters quiet on shadowing; real init below
    x = x_ref[...]                                    # (1, D) running hidden

    # Layers are inherently sequential; L is small and static, so unroll.
    for i in range(n_layers):
        p = vecs_ref[i]                               # (11, D)
        ln1w, ln1b = p[0:1], p[1:2]
        ln2w, ln2b = p[2:3], p[3:4]
        td, tf = p[4:5], p[5:6]
        kktk, vvtv, rrtr = p[6:7], p[7:8], p[8:9]
        tmk, tmr = p[9:10], p[10:11]

        st = st_ref[i]                                # (4, D) ORIGINAL state rows
        sa, sb, sc, sd = st[0:1], st[1:2], st[2:3], st[3:4]

        # ---------------- SA (attention-like time mixing) ----------------
        xn = layernorm(x, ln1w, ln1b)                 # (1, D)
        # One fused MXU push: rows = the three time-mixed inputs,
        # cols = the three projection matrices side by side.
        lhs = jnp.concatenate(
            [xn + kktk * sa, xn + vvtv * sa, xn + rrtr * sa], axis=0)   # (3, D)
        kw = key_w_ref[i].astype(jnp.float32)         # (D, 3D)
        prj = jnp.dot(lhs, kw, preferred_element_type=jnp.float32)      # (3, 3D)
        k = jnp.exp(prj[0:1, 0:D])
        v = prj[1:2, D:2 * D]
        r = jnp.exp(prj[2:3, 2 * D:3 * D])

        tfk = tf * k
        w = sb + v * tfk
        d = r * sc + tfk * r + sc + tfk
        rwkv = jnp.dot(w / d, out_w_ref[i].astype(jnp.float32),
                       preferred_element_type=jnp.float32)              # (1, D)
        sx = x + rwkv
        new_b = sb * td + k * v
        new_c = sc * td + k

        # ---------------- FF (channel mixing) ----------------
        xn2 = layernorm(sx, ln2w, ln2b)
        lhs2 = jnp.concatenate([xn2 + tmk * sd, xn2 + tmr * sd], axis=0)  # (2, D)
        fw = ffn_w_ref[i].astype(jnp.float32)         # (D, H+D)
        prj2 = jnp.dot(lhs2, fw, preferred_element_type=jnp.float32)      # (2, H+D)
        kf = jnp.square(jnp.maximum(prj2[0:1, 0:H], 0.0))                 # relu().square()
        rf = jnp.exp(prj2[1:2, H:H + D])
        kv = jnp.dot(kf, vffn_w_ref[i].astype(jnp.float32),
                     preferred_element_type=jnp.float32)                  # (1, D)
        x = sx + kv / (1.0 + rf)

        st_out_ref[i] = jnp.concatenate([xn, new_b, new_c, xn2], axis=0)  # (4, D)

    x_out_ref[...] = x


# -----------------------------------------------------------------------------
# One-time weight preparation (load time, NOT per forward call)
# -----------------------------------------------------------------------------
def prepare_weights(params, weight_dtype=jnp.bfloat16):
    """Transpose, fuse and bf16-cast the weights; pack the per-layer vectors."""
    L, D = params["ln1w"].shape
    H = params["key_ffn"].shape[1]

    key_t = jnp.swapaxes(params["key"], -1, -2)                    # (L, 3, D, D) (in, out)
    key_fused = jnp.transpose(key_t, (0, 2, 1, 3)).reshape(L, D, 3 * D)
    out_t = jnp.swapaxes(params["outputv"], -1, -2)                # (L, D, D)
    kffn_t = jnp.swapaxes(params["key_ffn"], -1, -2)               # (L, D, H)
    rffn_t = jnp.swapaxes(params["receptance_ffn"], -1, -2)        # (L, D, D)
    ffn_fused = jnp.concatenate([kffn_t, rffn_t], axis=-1)         # (L, D, H+D)
    vffn_t = jnp.swapaxes(params["value_ffn"], -1, -2)             # (L, H, D)

    vecs = jnp.stack(
        [params["ln1w"], params["ln1b"], params["ln2w"], params["ln2b"],
         params["time_decay"], params["time_first"],
         params["kktk"], params["vvtv"], params["rrtr"],
         params["time_mix_k_ffn"], params["time_mix_r_ffn"]],
        axis=1).astype(jnp.float32)                                # (L, 11, D)

    return {
        "vecs": vecs,
        "key_w": key_fused.astype(weight_dtype),                   # (L, D, 3D)
        "out_w": out_t.astype(weight_dtype),                       # (L, D, D)
        "ffn_w": ffn_fused.astype(weight_dtype),                   # (L, D, H+D)
        "vffn_w": vffn_t.astype(weight_dtype),                     # (L, H, D)
    }


# -----------------------------------------------------------------------------
# Forward wrapper (jittable): state plumbing + one grid-less pallas_call
# -----------------------------------------------------------------------------
def rwkv_layer_forward(x, state, prep, offset):
    """Equivalent of RWKV_LAYER.forward(x, state) -> (x, state)."""
    L, _, D = prep["vecs"].shape

    # Slice the per-layer state rows exactly like the torch .view(4, L, D).
    rx = state[offset * 4:(offset + L) * 4].reshape(4, L, D)
    st_in = jnp.transpose(rx, (1, 0, 2)).astype(jnp.float32)       # (L, 4, D)

    x_out, st_out = pl.pallas_call(
        _rwkv_stack_kernel,
        out_shape=(jax.ShapeDtypeStruct((1, D), jnp.float32),
                   jax.ShapeDtypeStruct((L, 4, D), jnp.float32)),
        # Grid-less: every operand is a single whole-array VMEM block (~300 KB
        # total at this size), DMA'd once; layers loop inside the kernel.
    )(
        x.reshape(1, D).astype(jnp.float32),
        prep["vecs"], st_in,
        prep["key_w"], prep["out_w"], prep["ffn_w"], prep["vffn_w"],
    )

    new_rx = jnp.transpose(st_out, (1, 0, 2)).reshape(4 * L, D)    # (4L, D)
    new_state = state.at[offset * 4:(offset + L) * 4].set(new_rx)
    return x_out.reshape(D), new_state


# -----------------------------------------------------------------------------
# Pure-JAX reference (mirrors the PyTorch forward) for validation
# -----------------------------------------------------------------------------
def rwkv_layer_reference(x, state, p, offset):
    L, D = p["ln1w"].shape
    hi = jax.lax.Precision.HIGHEST
    mv = lambda A, vec: jnp.dot(A, vec, precision=hi)

    rx = state[offset * 4:(offset + L) * 4].reshape(4, L, D)
    statea, stateb, statec, stated = rx[0], rx[1], rx[2], rx[3]
    kktk = p["kktk"] * statea
    vvtv = p["vvtv"] * statea
    rrtr = p["rrtr"] * statea
    tmk = p["time_mix_k_ffn"] * stated
    tmr = p["time_mix_r_ffn"] * stated

    def ln(v, w, b):
        m = v.mean()
        var = ((v - m) ** 2).mean()
        return (v - m) / jnp.sqrt(var + 1e-5) * w + b

    sa_n, sb_n, sc_n, sd_n = [], [], [], []
    for i in range(L):
        xn = ln(x, p["ln1w"][i], p["ln1b"][i])
        kw = p["key"][i]
        k = jnp.exp(mv(kw[0], xn + kktk[i]))
        v = mv(kw[1], xn + vvtv[i])
        r = jnp.exp(mv(kw[2], xn + rrtr[i]))
        tf, td = p["time_first"][i], p["time_decay"][i]
        w = stateb[i] + v * tf * k
        d = r * statec[i] + tf * k * r + statec[i] + tf * k
        sx = x + mv(p["outputv"][i], w / d)
        sa_n.append(xn)
        sb_n.append(stateb[i] * td + k * v)
        sc_n.append(statec[i] * td + k)

        xn2 = ln(sx, p["ln2w"][i], p["ln2b"][i])
        kf = jnp.maximum(mv(p["key_ffn"][i], xn2 + tmk[i]), 0.0) ** 2
        rf = jnp.exp(mv(p["receptance_ffn"][i], xn2 + tmr[i]))
        kv = mv(p["value_ffn"][i], kf)
        x = sx + kv / (1.0 + rf)
        sd_n.append(xn2)

    new_rx = jnp.concatenate(
        [jnp.stack(sa_n), jnp.stack(sb_n), jnp.stack(sc_n), jnp.stack(sd_n)], axis=0)
    return x, state.at[offset * 4:(offset + L) * 4].set(new_rx)


# -----------------------------------------------------------------------------
# Deterministic parameter construction (mirrors RWKV_LAYER.__init__ transforms)
# -----------------------------------------------------------------------------
def make_params(L, D, H):
    keys = iter(jax.random.split(jax.random.PRNGKey(0), 32))

    def rand(shape, scale):
        return jax.random.normal(next(keys), shape, dtype=jnp.float32) * scale

    kk = rand((L, D, D), 0.05)
    vv = rand((L, D, D), 0.05)
    rr = rand((L, D, D), 0.05)
    params = {
        "ln1w": 1.0 + rand((L, D), 0.05),
        "ln1b": rand((L, D), 0.05),
        "ln2w": 1.0 + rand((L, D), 0.05),
        "ln2b": rand((L, D), 0.05),
        "time_decay": jnp.exp(rand((L, D), 0.1)),        # exp() as in __init__
        "time_first": jnp.exp(rand((L, D), 0.1)),        # exp() as in __init__
        "key": jnp.stack([kk, vv, -rr], axis=1),         # [kk, vv, -rr] stacking
        "outputv": rand((L, D, D), 0.05),
        "kktk": rand((L, D), 0.3),
        "vvtv": rand((L, D), 0.3),
        "rrtr": rand((L, D), 0.3),
        "time_mix_k_ffn": rand((L, D), 0.3),
        "time_mix_r_ffn": rand((L, D), 0.3),
        "key_ffn": rand((L, H, D), 0.05),
        "receptance_ffn": -rand((L, D, D), 0.05),        # negated as in __init__
        "value_ffn": rand((L, D, H), 0.05),
    }
    return params


if __name__ == "__main__":
    L = 2          # layers handled by this RWKV_LAYER block
    D = 64         # embedding size
    H = 256        # FFN hidden size (4 * D)
    OFFSET = 1     # block offset into the global state

    params = make_params(L, D, H)

    # Weights are stored/streamed as bf16 in the kernel; quantize the reference's
    # copy identically so the check isolates kernel errors from storage precision.
    qparams = dict(params)
    for name in ("key", "outputv", "key_ffn", "receptance_ffn", "value_ffn"):
        qparams[name] = params[name].astype(jnp.bfloat16).astype(jnp.float32)

    prep = prepare_weights(qparams)          # one-time, outside the jitted forward

    dkeys = jax.random.split(jax.random.PRNGKey(1), 2)
    x = jax.random.normal(dkeys[0], (D,), dtype=jnp.float32) * 0.5
    n_state_rows = (OFFSET + L) * 4 + 2
    state = jax.random.normal(dkeys[1], (n_state_rows, D), dtype=jnp.float32) * 0.5

    fwd = jax.jit(functools.partial(rwkv_layer_forward, offset=OFFSET))
    x_out, state_out = fwd(x, state, prep)
    jax.block_until_ready((x_out, state_out))

    x_ref, state_ref = rwkv_layer_reference(x, state, qparams, OFFSET)
    assert jnp.allclose(x_out, x_ref, atol=2e-3, rtol=2e-3), "x mismatch"
    assert jnp.allclose(state_out, state_ref, atol=2e-3, rtol=2e-3), "state mismatch"

    print("KERNEL_OK")
</pallas_src>

<mosaic_0001>
module attributes {stable_mosaic.version = 11 : i64} {
  func.func @_rwkv_stack_kernel(%arg0: memref<1x64xf32, #tpu.memory_space<vmem>>, %arg1: memref<2x11x64xf32, #tpu.memory_space<vmem>>, %arg2: memref<2x4x64xf32, #tpu.memory_space<vmem>>, %arg3: memref<2x64x192xbf16, #tpu.memory_space<vmem>>, %arg4: memref<2x64x64xbf16, #tpu.memory_space<vmem>>, %arg5: memref<2x64x320xbf16, #tpu.memory_space<vmem>>, %arg6: memref<2x256x64xbf16, #tpu.memory_space<vmem>>, %arg7: memref<1x64xf32, #tpu.memory_space<vmem>>, %arg8: memref<2x4x64xf32, #tpu.memory_space<vmem>>) attributes {dimension_semantics = [], scalar_prefetch = 0 : i64, scratch_operands = 0 : i64, tpu.core_type = #tpu.core_type<tc>} {
    %c0 = arith.constant 0 : index
    %c0_0 = arith.constant 0 : index
    %0 = vector.load %arg0[%c0, %c0_0] : memref<1x64xf32, #tpu.memory_space<vmem>>, vector<1x64xf32>
    %c0_1 = arith.constant 0 : index
    %c0_2 = arith.constant 0 : index
    %c0_3 = arith.constant 0 : index
    %1 = vector.load %arg1[%c0_1, %c0_2, %c0_3] : memref<2x11x64xf32, #tpu.memory_space<vmem>>, vector<1x11x64xf32>
    %2 = vector.shape_cast %1 : vector<1x11x64xf32> to vector<11x64xf32>
    %3 = vector.extract_strided_slice %2 {offsets = [0, 0], sizes = [1, 64], strides = [1, 1]} : vector<11x64xf32> to vector<1x64xf32>
    %4 = vector.extract_strided_slice %2 {offsets = [1, 0], sizes = [1, 64], strides = [1, 1]} : vector<11x64xf32> to vector<1x64xf32>
    %5 = vector.extract_strided_slice %2 {offsets = [2, 0], sizes = [1, 64], strides = [1, 1]} : vector<11x64xf32> to vector<1x64xf32>
    %6 = vector.extract_strided_slice %2 {offsets = [3, 0], sizes = [1, 64], strides = [1, 1]} : vector<11x64xf32> to vector<1x64xf32>
    %7 = vector.extract_strided_slice %2 {offsets = [4, 0], sizes = [1, 64], strides = [1, 1]} : vector<11x64xf32> to vector<1x64xf32>
    %8 = vector.extract_strided_slice %2 {offsets = [5, 0], sizes = [1, 64], strides = [1, 1]} : vector<11x64xf32> to vector<1x64xf32>
    %9 = vector.extract_strided_slice %2 {offsets = [6, 0], sizes = [1, 64], strides = [1, 1]} : vector<11x64xf32> to vector<1x64xf32>
    %10 = vector.extract_strided_slice %2 {offsets = [7, 0], sizes = [1, 64], strides = [1, 1]} : vector<11x64xf32> to vector<1x64xf32>
    %11 = vector.extract_strided_slice %2 {offsets = [8, 0], sizes = [1, 64], strides = [1, 1]} : vector<11x64xf32> to vector<1x64xf32>
    %12 = vector.extract_strided_slice %2 {offsets = [9, 0], sizes = [1, 64], strides = [1, 1]} : vector<11x64xf32> to vector<1x64xf32>
    %13 = vector.extract_strided_slice %2 {offsets = [10, 0], sizes = [1, 64], strides = [1, 1]} : vector<11x64xf32> to vector<1x64xf32>
    %c0_4 = arith.constant 0 : index
    %c0_5 = arith.constant 0 : index
    %c0_6 = arith.constant 0 : index
    %14 = vector.load %arg2[%c0_4, %c0_5, %c0_6] : memref<2x4x64xf32, #tpu.memory_space<vmem>>, vector<1x4x64xf32>
    %15 = vector.shape_cast %14 : vector<1x4x64xf32> to vector<4x64xf32>
    %16 = vector.extract_strided_slice %15 {offsets = [0, 0], sizes = [1, 64], strides = [1, 1]} : vector<4x64xf32> to vector<1x64xf32>
    %17 = vector.extract_strided_slice %15 {offsets = [1, 0], sizes = [1, 64], strides = [1, 1]} : vector<4x64xf32> to vector<1x64xf32>
    %18 = vector.extract_strided_slice %15 {offsets = [2, 0], sizes = [1, 64], strides = [1, 1]} : vector<4x64xf32> to vector<1x64xf32>
    %19 = vector.extract_strided_slice %15 {offsets = [3, 0], sizes = [1, 64], strides = [1, 1]} : vector<4x64xf32> to vector<1x64xf32>
    %cst = arith.constant dense<0.000000e+00> : vector<1xf32>
    %20 = vector.multi_reduction <add>, %0, %cst [1] : vector<1x64xf32> to vector<1xf32>
    %21 = vector.shape_cast %20 : vector<1xf32> to vector<1x1xf32>
    %cst_7 = arith.constant 6.400000e+01 : f32
    %22 = vector.broadcast %cst_7 : f32 to vector<1x1xf32>
    %23 = arith.divf %21, %22 : vector<1x1xf32>
    %24 = vector.broadcast %23 : vector<1x1xf32> to vector<1x64xf32>
    %25 = arith.subf %0, %24 : vector<1x64xf32>
    %26 = arith.mulf %25, %25 : vector<1x64xf32>
    %cst_8 = arith.constant dense<0.000000e+00> : vector<1xf32>
    %27 = vector.multi_reduction <add>, %26, %cst_8 [1] : vector<1x64xf32> to vector<1xf32>
    %28 = vector.shape_cast %27 : vector<1xf32> to vector<1x1xf32>
    %cst_9 = arith.constant 6.400000e+01 : f32
    %29 = vector.broadcast %cst_9 : f32 to vector<1x1xf32>
    %30 = arith.divf %28, %29 : vector<1x1xf32>
    %cst_10 = arith.constant 9.99999974E-6 : f32
    %31 = vector.broadcast %cst_10 : f32 to vector<1x1xf32>
    %32 = arith.addf %30, %31 : vector<1x1xf32>
    %33 = math.rsqrt %32 : vector<1x1xf32>
    %34 = vector.broadcast %33 : vector<1x1xf32> to vector<1x64xf32>
    %35 = arith.mulf %25, %34 : vector<1x64xf32>
    %36 = arith.mulf %35, %3 : vector<1x64xf32>
    %37 = arith.addf %36, %4 : vector<1x64xf32>
    %38 = arith.mulf %9, %16 : vector<1x64xf32>
    %39 = arith.addf %37, %38 : vector<1x64xf32>
    %40 = arith.mulf %10, %16 : vector<1x64xf32>
    %41 = arith.addf %37, %40 : vector<1x64xf32>
    %42 = arith.mulf %11, %16 : vector<1x64xf32>
    %43 = arith.addf %37, %42 : vector<1x64xf32>
    %44 = tpu.concatenate %39, %41, %43 in 0 : vector<1x64xf32>, vector<1x64xf32>, vector<1x64xf32> -> vector<3x64xf32>
    %c0_11 = arith.constant 0 : index
    %c0_12 = arith.constant 0 : index
    %c0_13 = arith.constant 0 : index
    %45 = vector.load %arg3[%c0_11, %c0_12, %c0_13] : memref<2x64x192xbf16, #tpu.memory_space<vmem>>, vector<1x64x192xbf16>
    %46 = vector.shape_cast %45 : vector<1x64x192xbf16> to vector<64x192xbf16>
    %47 = arith.extf %46 : vector<64x192xbf16> to vector<64x192xf32>
    %cst_14 = arith.constant dense<0.000000e+00> : vector<3x192xf32>
    %48 = tpu.matmul %44, %47, %cst_14 {dimension_numbers = #tpu.dot_dimension_numbers<[1], [0], [0], [1], [0, 0, 1, 1], [], []>} : vector<3x64xf32>, vector<64x192xf32>, vector<3x192xf32> -> vector<3x192xf32>
    %49 = vector.extract_strided_slice %48 {offsets = [0, 0], sizes = [1, 64], strides = [1, 1]} : vector<3x192xf32> to vector<1x64xf32>
    %50 = math.exp %49 : vector<1x64xf32>
    %51 = vector.extract_strided_slice %48 {offsets = [1, 64], sizes = [1, 64], strides = [1, 1]} : vector<3x192xf32> to vector<1x64xf32>
    %52 = vector.extract_strided_slice %48 {offsets = [2, 128], sizes = [1, 64], strides = [1, 1]} : vector<3x192xf32> to vector<1x64xf32>
    %53 = math.exp %52 : vector<1x64xf32>
    %54 = arith.mulf %8, %50 : vector<1x64xf32>
    %55 = arith.mulf %51, %54 : vector<1x64xf32>
    %56 = arith.addf %17, %55 : vector<1x64xf32>
    %57 = arith.mulf %53, %18 : vector<1x64xf32>
    %58 = arith.mulf %54, %53 : vector<1x64xf32>
    %59 = arith.addf %57, %58 : vector<1x64xf32>
    %60 = arith.addf %59, %18 : vector<1x64xf32>
    %61 = arith.addf %60, %54 : vector<1x64xf32>
    %62 = arith.divf %56, %61 : vector<1x64xf32>
    %c0_15 = arith.constant 0 : index
    %c0_16 = arith.constant 0 : index
    %c0_17 = arith.constant 0 : index
    %63 = vector.load %arg4[%c0_15, %c0_16, %c0_17] : memref<2x64x64xbf16, #tpu.memory_space<vmem>>, vector<1x64x64xbf16>
    %64 = vector.shape_cast %63 : vector<1x64x64xbf16> to vector<64x64xbf16>
    %65 = arith.extf %64 : vector<64x64xbf16> to vector<64x64xf32>
    %cst_18 = arith.constant dense<0.000000e+00> : vector<1x64xf32>
    %66 = tpu.matmul %62, %65, %cst_18 {dimension_numbers = #tpu.dot_dimension_numbers<[1], [0], [0], [1], [0, 0, 1, 1], [], []>} : vector<1x64xf32>, vector<64x64xf32>, vector<1x64xf32> -> vector<1x64xf32>
    %67 = arith.addf %0, %66 : vector<1x64xf32>
    %68 = arith.mulf %17, %7 : vector<1x64xf32>
    %69 = arith.mulf %50, %51 : vector<1x64xf32>
    %70 = arith.addf %68, %69 : vector<1x64xf32>
    %71 = arith.mulf %18, %7 : vector<1x64xf32>
    %72 = arith.addf %71, %50 : vector<1x64xf32>
    %cst_19 = arith.constant dense<0.000000e+00> : vector<1xf32>
    %73 = vector.multi_reduction <add>, %67, %cst_19 [1] : vector<1x64xf32> to vector<1xf32>
    %74 = vector.shape_cast %73 : vector<1xf32> to vector<1x1xf32>
    %cst_20 = arith.constant 6.400000e+01 : f32
    %75 = vector.broadcast %cst_20 : f32 to vector<1x1xf32>
    %76 = arith.divf %74, %75 : vector<1x1xf32>
    %77 = vector.broadcast %76 : vector<1x1xf32> to vector<1x64xf32>
    %78 = arith.subf %67, %77 : vector<1x64xf32>
    %79 = arith.mulf %78, %78 : vector<1x64xf32>
    %cst_21 = arith.constant dense<0.000000e+00> : vector<1xf32>
    %80 = vector.multi_reduction <add>, %79, %cst_21 [1] : vector<1x64xf32> to vector<1xf32>
    %81 = vector.shape_cast %80 : vector<1xf32> to vector<1x1xf32>
    %cst_22 = arith.constant 6.400000e+01 : f32
    %82 = vector.broadcast %cst_22 : f32 to vector<1x1xf32>
    %83 = arith.divf %81, %82 : vector<1x1xf32>
    %cst_23 = arith.constant 9.99999974E-6 : f32
    %84 = vector.broadcast %cst_23 : f32 to vector<1x1xf32>
    %85 = arith.addf %83, %84 : vector<1x1xf32>
    %86 = math.rsqrt %85 : vector<1x1xf32>
    %87 = vector.broadcast %86 : vector<1x1xf32> to vector<1x64xf32>
    %88 = arith.mulf %78, %87 : vector<1x64xf32>
    %89 = arith.mulf %88, %5 : vector<1x64xf32>
    %90 = arith.addf %89, %6 : vector<1x64xf32>
    %91 = arith.mulf %12, %19 : vector<1x64xf32>
    %92 = arith.addf %90, %91 : vector<1x64xf32>
    %93 = arith.mulf %13, %19 : vector<1x64xf32>
    %94 = arith.addf %90, %93 : vector<1x64xf32>
    %95 = tpu.concatenate %92, %94 in 0 : vector<1x64xf32>, vector<1x64xf32> -> vector<2x64xf32>
    %c0_24 = arith.constant 0 : index
    %c0_25 = arith.constant 0 : index
    %c0_26 = arith.constant 0 : index
    %96 = vector.load %arg5[%c0_24, %c0_25, %c0_26] : memref<2x64x320xbf16, #tpu.memory_space<vmem>>, vector<1x64x320xbf16>
    %97 = vector.shape_cast %96 : vector<1x64x320xbf16> to vector<64x320xbf16>
    %98 = arith.extf %97 : vector<64x320xbf16> to vector<64x320xf32>
    %cst_27 = arith.constant dense<0.000000e+00> : vector<2x320xf32>
    %99 = tpu.matmul %95, %98, %cst_27 {dimension_numbers = #tpu.dot_dimension_numbers<[1], [0], [0], [1], [0, 0, 1, 1], [], []>} : vector<2x64xf32>, vector<64x320xf32>, vector<2x320xf32> -> vector<2x320xf32>
    %100 = vector.extract_strided_slice %99 {offsets = [0, 0], sizes = [1, 256], strides = [1, 1]} : vector<2x320xf32> to vector<1x256xf32>
    %cst_28 = arith.constant 0.000000e+00 : f32
    %101 = vector.broadcast %cst_28 : f32 to vector<1x256xf32>
    %102 = arith.maximumf %100, %101 : vector<1x256xf32>
    %103 = arith.mulf %102, %102 : vector<1x256xf32>
    %104 = vector.extract_strided_slice %99 {offsets = [1, 256], sizes = [1, 64], strides = [1, 1]} : vector<2x320xf32> to vector<1x64xf32>
    %105 = math.exp %104 : vector<1x64xf32>
    %c0_29 = arith.constant 0 : index
    %c0_30 = arith.constant 0 : index
    %c0_31 = arith.constant 0 : index
    %106 = vector.load %arg6[%c0_29, %c0_30, %c0_31] : memref<2x256x64xbf16, #tpu.memory_space<vmem>>, vector<1x256x64xbf16>
    %107 = vector.shape_cast %106 : vector<1x256x64xbf16> to vector<256x64xbf16>
    %108 = arith.extf %107 : vector<256x64xbf16> to vector<256x64xf32>
    %cst_32 = arith.constant dense<0.000000e+00> : vector<1x64xf32>
    %109 = tpu.matmul %103, %108, %cst_32 {dimension_numbers = #tpu.dot_dimension_numbers<[1], [0], [0], [1], [0, 0, 1, 1], [], []>} : vector<1x256xf32>, vector<256x64xf32>, vector<1x64xf32> -> vector<1x64xf32>
    %cst_33 = arith.constant 1.000000e+00 : f32
    %110 = vector.broadcast %cst_33 : f32 to vector<1x64xf32>
    %111 = arith.addf %110, %105 : vector<1x64xf32>
    %112 = arith.divf %109, %111 : vector<1x64xf32>
    %113 = arith.addf %67, %112 : vector<1x64xf32>
    %114 = tpu.concatenate %37, %70, %72, %90 in 0 : vector<1x64xf32>, vector<1x64xf32>, vector<1x64xf32>, vector<1x64xf32> -> vector<4x64xf32>
    %c0_34 = arith.constant 0 : index
    %c0_35 = arith.constant 0 : index
    %c0_36 = arith.constant 0 : index
    %115 = vector.load %arg8[%c0_34, %c0_35, %c0_36] : memref<2x4x64xf32, #tpu.memory_space<vmem>>, vector<1x4x64xf32>
    %116 = vector.shape_cast %115 : vector<1x4x64xf32> to vector<4x64xf32>
    %117 = vector.shape_cast %114 : vector<4x64xf32> to vector<1x4x64xf32>
    tpu.vector_store %arg8[%c0_34, %c0_35, %c0_36], %117 {strides = array<i32>} : memref<2x4x64xf32, #tpu.memory_space<vmem>>, vector<1x4x64xf32>,
    %c1 = arith.constant 1 : index
    %c0_37 = arith.constant 0 : index
    %c0_38 = arith.constant 0 : index
    %118 = vector.load %arg1[%c1, %c0_37, %c0_38] : memref<2x11x64xf32, #tpu.memory_space<vmem>>, vector<1x11x64xf32>
    %119 = vector.shape_cast %118 : vector<1x11x64xf32> to vector<11x64xf32>
    %120 = vector.extract_strided_slice %119 {offsets = [0, 0], sizes = [1, 64], strides = [1, 1]} : vector<11x64xf32> to vector<1x64xf32>
    %121 = vector.extract_strided_slice %119 {offsets = [1, 0], sizes = [1, 64], strides = [1, 1]} : vector<11x64xf32> to vector<1x64xf32>
    %122 = vector.extract_strided_slice %119 {offsets = [2, 0], sizes = [1, 64], strides = [1, 1]} : vector<11x64xf32> to vector<1x64xf32>
    %123 = vector.extract_strided_slice %119 {offsets = [3, 0], sizes = [1, 64], strides = [1, 1]} : vector<11x64xf32> to vector<1x64xf32>
    %124 = vector.extract_strided_slice %119 {offsets = [4, 0], sizes = [1, 64], strides = [1, 1]} : vector<11x64xf32> to vector<1x64xf32>
    %125 = vector.extract_strided_slice %119 {offsets = [5, 0], sizes = [1, 64], strides = [1, 1]} : vector<11x64xf32> to vector<1x64xf32>
    %126 = vector.extract_strided_slice %119 {offsets = [6, 0], sizes = [1, 64], strides = [1, 1]} : vector<11x64xf32> to vector<1x64xf32>
    %127 = vector.extract_strided_slice %119 {offsets = [7, 0], sizes = [1, 64], strides = [1, 1]} : vector<11x64xf32> to vector<1x64xf32>
    %128 = vector.extract_strided_slice %119 {offsets = [8, 0], sizes = [1, 64], strides = [1, 1]} : vector<11x64xf32> to vector<1x64xf32>
    %129 = vector.extract_strided_slice %119 {offsets = [9, 0], sizes = [1, 64], strides = [1, 1]} : vector<11x64xf32> to vector<1x64xf32>
    %130 = vector.extract_strided_slice %119 {offsets = [10, 0], sizes = [1, 64], strides = [1, 1]} : vector<11x64xf32> to vector<1x64xf32>
    %c1_39 = arith.constant 1 : index
    %c0_40 = arith.constant 0 : index
    %c0_41 = arith.constant 0 : index
    %131 = vector.load %arg2[%c1_39, %c0_40, %c0_41] : memref<2x4x64xf32, #tpu.memory_space<vmem>>, vector<1x4x64xf32>
    %132 = vector.shape_cast %131 : vector<1x4x64xf32> to vector<4x64xf32>
    %133 = vector.extract_strided_slice %132 {offsets = [0, 0], sizes = [1, 64], strides = [1, 1]} : vector<4x64xf32> to vector<1x64xf32>
    %134 = vector.extract_strided_slice %132 {offsets = [1, 0], sizes = [1, 64], strides = [1, 1]} : vector<4x64xf32> to vector<1x64xf32>
    %135 = vector.extract_strided_slice %132 {offsets = [2, 0], sizes = [1, 64], strides = [1, 1]} : vector<4x64xf32> to vector<1x64xf32>
    %136 = vector.extract_strided_slice %132 {offsets = [3, 0], sizes = [1, 64], strides = [1, 1]} : vector<4x64xf32> to vector<1x64xf32>
    %cst_42 = arith.constant dense<0.000000e+00> : vector<1xf32>
    %137 = vector.multi_reduction <add>, %113, %cst_42 [1] : vector<1x64xf32> to vector<1xf32>
    %138 = vector.shape_cast %137 : vector<1xf32> to vector<1x1xf32>
    %cst_43 = arith.constant 6.400000e+01 : f32
    %139 = vector.broadcast %cst_43 : f32 to vector<1x1xf32>
    %140 = arith.divf %138, %139 : vector<1x1xf32>
    %141 = vector.broadcast %140 : vector<1x1xf32> to vector<1x64xf32>
    %142 = arith.subf %113, %141 : vector<1x64xf32>
    %143 = arith.mulf %142, %142 : vector<1x64xf32>
    %cst_44 = arith.constant dense<0.000000e+00> : vector<1xf32>
    %144 = vector.multi_reduction <add>, %143, %cst_44 [1] : vector<1x64xf32> to vector<1xf32>
    %145 = vector.shape_cast %144 : vector<1xf32> to vector<1x1xf32>
    %cst_45 = arith.constant 6.400000e+01 : f32
    %146 = vector.broadcast %cst_45 : f32 to vector<1x1xf32>
    %147 = arith.divf %145, %146 : vector<1x1xf32>
    %cst_46 = arith.constant 9.99999974E-6 : f32
    %148 = vector.broadcast %cst_46 : f32 to vector<1x1xf32>
    %149 = arith.addf %147, %148 : vector<1x1xf32>
    %150 = math.rsqrt %149 : vector<1x1xf32>
    %151 = vector.broadcast %150 : vector<1x1xf32> to vector<1x64xf32>
    %152 = arith.mulf %142, %151 : vector<1x64xf32>
    %153 = arith.mulf %152, %120 : vector<1x64xf32>
    %154 = arith.addf %153, %121 : vector<1x64xf32>
    %155 = arith.mulf %126, %133 : vector<1x64xf32>
    %156 = arith.addf %154, %155 : vector<1x64xf32>
    %157 = arith.mulf %127, %133 : vector<1x64xf32>
    %158 = arith.addf %154, %157 : vector<1x64xf32>
    %159 = arith.mulf %128, %133 : vector<1x64xf32>
    %160 = arith.addf %154, %159 : vector<1x64xf32>
    %161 = tpu.concatenate %156, %158, %160 in 0 : vector<1x64xf32>, vector<1x64xf32>, vector<1x64xf32> -> vector<3x64xf32>
    %c1_47 = arith.constant 1 : index
    %c0_48 = arith.constant 0 : index
    %c0_49 = arith.constant 0 : index
    %162 = vector.load %arg3[%c1_47, %c0_48, %c0_49] : memref<2x64x192xbf16, #tpu.memory_space<vmem>>, vector<1x64x192xbf16>
    %163 = vector.shape_cast %162 : vector<1x64x192xbf16> to vector<64x192xbf16>
    %164 = arith.extf %163 : vector<64x192xbf16> to vector<64x192xf32>
    %cst_50 = arith.constant dense<0.000000e+00> : vector<3x192xf32>
    %165 = tpu.matmul %161, %164, %cst_50 {dimension_numbers = #tpu.dot_dimension_numbers<[1], [0], [0], [1], [0, 0, 1, 1], [], []>} : vector<3x64xf32>, vector<64x192xf32>, vector<3x192xf32> -> vector<3x192xf32>
    %166 = vector.extract_strided_slice %165 {offsets = [0, 0], sizes = [1, 64], strides = [1, 1]} : vector<3x192xf32> to vector<1x64xf32>
    %167 = math.exp %166 : vector<1x64xf32>
    %168 = vector.extract_strided_slice %165 {offsets = [1, 64], sizes = [1, 64], strides = [1, 1]} : vector<3x192xf32> to vector<1x64xf32>
    %169 = vector.extract_strided_slice %165 {offsets = [2, 128], sizes = [1, 64], strides = [1, 1]} : vector<3x192xf32> to vector<1x64xf32>
    %170 = math.exp %169 : vector<1x64xf32>
    %171 = arith.mulf %125, %167 : vector<1x64xf32>
    %172 = arith.mulf %168, %171 : vector<1x64xf32>
    %173 = arith.addf %134, %172 : vector<1x64xf32>
    %174 = arith.mulf %170, %135 : vector<1x64xf32>
    %175 = arith.mulf %171, %170 : vector<1x64xf32>
    %176 = arith.addf %174, %175 : vector<1x64xf32>
    %177 = arith.addf %176, %135 : vector<1x64xf32>
    %178 = arith.addf %177, %171 : vector<1x64xf32>
    %179 = arith.divf %173, %178 : vector<1x64xf32>
    %c1_51 = arith.constant 1 : index
    %c0_52 = arith.constant 0 : index
    %c0_53 = arith.constant 0 : index
    %180 = vector.load %arg4[%c1_51, %c0_52, %c0_53] : memref<2x64x64xbf16, #tpu.memory_space<vmem>>, vector<1x64x64xbf16>
    %181 = vector.shape_cast %180 : vector<1x64x64xbf16> to vector<64x64xbf16>
    %182 = arith.extf %181 : vector<64x64xbf16> to vector<64x64xf32>
    %cst_54 = arith.constant dense<0.000000e+00> : vector<1x64xf32>
    %183 = tpu.matmul %179, %182, %cst_54 {dimension_numbers = #tpu.dot_dimension_numbers<[1], [0], [0], [1], [0, 0, 1, 1], [], []>} : vector<1x64xf32>, vector<64x64xf32>, vector<1x64xf32> -> vector<1x64xf32>
    %184 = arith.addf %113, %183 : vector<1x64xf32>
    %185 = arith.mulf %134, %124 : vector<1x64xf32>
    %186 = arith.mulf %167, %168 : vector<1x64xf32>
    %187 = arith.addf %185, %186 : vector<1x64xf32>
    %188 = arith.mulf %135, %124 : vector<1x64xf32>
    %189 = arith.addf %188, %167 : vector<1x64xf32>
    %cst_55 = arith.constant dense<0.000000e+00> : vector<1xf32>
    %190 = vector.multi_reduction <add>, %184, %cst_55 [1] : vector<1x64xf32> to vector<1xf32>
    %191 = vector.shape_cast %190 : vector<1xf32> to vector<1x1xf32>
    %cst_56 = arith.constant 6.400000e+01 : f32
    %192 = vector.broadcast %cst_56 : f32 to vector<1x1xf32>
    %193 = arith.divf %191, %192 : vector<1x1xf32>
    %194 = vector.broadcast %193 : vector<1x1xf32> to vector<1x64xf32>
    %195 = arith.subf %184, %194 : vector<1x64xf32>
    %196 = arith.mulf %195, %195 : vector<1x64xf32>
    %cst_57 = arith.constant dense<0.000000e+00> : vector<1xf32>
    %197 = vector.multi_reduction <add>, %196, %cst_57 [1] : vector<1x64xf32> to vector<1xf32>
    %198 = vector.shape_cast %197 : vector<1xf32> to vector<1x1xf32>
    %cst_58 = arith.constant 6.400000e+01 : f32
    %199 = vector.broadcast %cst_58 : f32 to vector<1x1xf32>
    %200 = arith.divf %198, %199 : vector<1x1xf32>
    %cst_59 = arith.constant 9.99999974E-6 : f32
    %201 = vector.broadcast %cst_59 : f32 to vector<1x1xf32>
    %202 = arith.addf %200, %201 : vector<1x1xf32>
    %203 = math.rsqrt %202 : vector<1x1xf32>
    %204 = vector.broadcast %203 : vector<1x1xf32> to vector<1x64xf32>
    %205 = arith.mulf %195, %204 : vector<1x64xf32>
    %206 = arith.mulf %205, %122 : vector<1x64xf32>
    %207 = arith.addf %206, %123 : vector<1x64xf32>
    %208 = arith.mulf %129, %136 : vector<1x64xf32>
    %209 = arith.addf %207, %208 : vector<1x64xf32>
    %210 = arith.mulf %130, %136 : vector<1x64xf32>
    %211 = arith.addf %207, %210 : vector<1x64xf32>
    %212 = tpu.concatenate %209, %211 in 0 : vector<1x64xf32>, vector<1x64xf32> -> vector<2x64xf32>
    %c1_60 = arith.constant 1 : index
    %c0_61 = arith.constant 0 : index
    %c0_62 = arith.constant 0 : index
    %213 = vector.load %arg5[%c1_60, %c0_61, %c0_62] : memref<2x64x320xbf16, #tpu.memory_space<vmem>>, vector<1x64x320xbf16>
    %214 = vector.shape_cast %213 : vector<1x64x320xbf16> to vector<64x320xbf16>
    %215 = arith.extf %214 : vector<64x320xbf16> to vector<64x320xf32>
    %cst_63 = arith.constant dense<0.000000e+00> : vector<2x320xf32>
    %216 = tpu.matmul %212, %215, %cst_63 {dimension_numbers = #tpu.dot_dimension_numbers<[1], [0], [0], [1], [0, 0, 1, 1], [], []>} : vector<2x64xf32>, vector<64x320xf32>, vector<2x320xf32> -> vector<2x320xf32>
    %217 = vector.extract_strided_slice %216 {offsets = [0, 0], sizes = [1, 256], strides = [1, 1]} : vector<2x320xf32> to vector<1x256xf32>
    %cst_64 = arith.constant 0.000000e+00 : f32
    %218 = vector.broadcast %cst_64 : f32 to vector<1x256xf32>
    %219 = arith.maximumf %217, %218 : vector<1x256xf32>
    %220 = arith.mulf %219, %219 : vector<1x256xf32>
    %221 = vector.extract_strided_slice %216 {offsets = [1, 256], sizes = [1, 64], strides = [1, 1]} : vector<2x320xf32> to vector<1x64xf32>
    %222 = math.exp %221 : vector<1x64xf32>
    %c1_65 = arith.constant 1 : index
    %c0_66 = arith.constant 0 : index
    %c0_67 = arith.constant 0 : index
    %223 = vector.load %arg6[%c1_65, %c0_66, %c0_67] : memref<2x256x64xbf16, #tpu.memory_space<vmem>>, vector<1x256x64xbf16>
    %224 = vector.shape_cast %223 : vector<1x256x64xbf16> to vector<256x64xbf16>
    %225 = arith.extf %224 : vector<256x64xbf16> to vector<256x64xf32>
    %cst_68 = arith.constant dense<0.000000e+00> : vector<1x64xf32>
    %226 = tpu.matmul %220, %225, %cst_68 {dimension_numbers = #tpu.dot_dimension_numbers<[1], [0], [0], [1], [0, 0, 1, 1], [], []>} : vector<1x256xf32>, vector<256x64xf32>, vector<1x64xf32> -> vector<1x64xf32>
    %cst_69 = arith.constant 1.000000e+00 : f32
    %227 = vector.broadcast %cst_69 : f32 to vector<1x64xf32>
    %228 = arith.addf %227, %222 : vector<1x64xf32>
    %229 = arith.divf %226, %228 : vector<1x64xf32>
    %230 = arith.addf %184, %229 : vector<1x64xf32>
    %231 = tpu.concatenate %154, %187, %189, %207 in 0 : vector<1x64xf32>, vector<1x64xf32>, vector<1x64xf32>, vector<1x64xf32> -> vector<4x64xf32>
    %c1_70 = arith.constant 1 : index
    %c0_71 = arith.constant 0 : index
    %c0_72 = arith.constant 0 : index
    %232 = vector.load %arg8[%c1_70, %c0_71, %c0_72] : memref<2x4x64xf32, #tpu.memory_space<vmem>>, vector<1x4x64xf32>
    %233 = vector.shape_cast %232 : vector<1x4x64xf32> to vector<4x64xf32>
    %234 = vector.shape_cast %231 : vector<4x64xf32> to vector<1x4x64xf32>
    tpu.vector_store %arg8[%c1_70, %c0_71, %c0_72], %234 {strides = array<i32>} : memref<2x4x64xf32, #tpu.memory_space<vmem>>, vector<1x4x64xf32>,
    %c0_73 = arith.constant 0 : index
    %c0_74 = arith.constant 0 : index
    %235 = vector.load %arg7[%c0_73, %c0_74] : memref<1x64xf32, #tpu.memory_space<vmem>>, vector<1x64xf32>
    tpu.vector_store %arg7[%c0_73, %c0_74], %230 {strides = array<i32>} : memref<1x64xf32, #tpu.memory_space<vmem>>, vector<1x64xf32>,
    return
  }
}

</mosaic_0001>

<bundles_post_ra>
// kernel: rwkv_layer_forward.1
= control target key start
LH: loop header
LB: loop body
LE: loop exit
PB: predicated region body
PF: predicated region fallthrough
CT: control target
= control target key end

     0   :  { %vm33_vm0 = vcmask 516096   ;;  %s2015_s0 = inlined_call_operand.vmem [shape: f32[1,64], index: 0, kind: input, shape index: {}]   ;;  %s2016_s1 = inlined_call_operand.vmem [shape: f32[2,11,64], index: 1, kind: input, shape index: {}]   ;;  %s2017_s2 = inlined_call_operand.vmem [shape: f32[2,4,64], index: 2, kind: input, shape index: {}]   ;;  %s2018_s3 = inlined_call_operand.vmem [shape: bf16[2,64,192], index: 3, kind: input, shape index: {}]   ;;  %s2019_s4 = inlined_call_operand.vmem [shape: bf16[2,64,64], index: 4, kind: input, shape index: {}]   ;;  %s2020_s5 = inlined_call_operand.vmem [shape: bf16[2,64,320], index: 5, kind: input, shape index: {}]   ;;  %s2021_s6 = inlined_call_operand.vmem [shape: bf16[2,256,64], index: 6, kind: input, shape index: {}]   ;;  %s2022_s7 = inlined_call_operand.hbm [shape: f32[1,64], index: 7, kind: output, shape index: {0}]   ;;  %s2023_s8 = inlined_call_operand.vmem [shape: f32[2,4,64], index: 8, kind: output, shape index: {1}]  }
   0x1   :  { %v1515_v0 = vld [vmem:[%s2015_s0] sm:$0x1] }
   0x2   :  { %14 = vsyncpa [#allocation3], 0  ;;  %v34_v1 = vsel %vm33_vm0, %v1515_v0, 0.0  ;;  %v1464_v2 = vmov 64.0   ;;  %v1522_v3 = vld [vmem:[%s2016_s1] sm:$0xff]  ;;  %v108_v19 = vld [vmem:[%s2018_s3 + $0x38] sm:$0xff] }
   0x3   :  { %35 = vadd.xlane.f32.xlu0 %v34_v1  ;;  %1408 = vrcp.f32 %v1464_v2  ;;  %65 = vst [vmem:[#allocation1] sm:$0xff] %v1522_v3  ;;  %v1537_v15 = vld [vmem:[%s2017_s2] sm:$0xf]  ;;  %v123_v21 = vunpack.c.l.bf16 %v108_v19  ;;  %v124_v22 = vunpack.c.h.bf16 %v108_v19  ;;  %v107_v23 = vld [vmem:[%s2018_s3 + $0x30] sm:$0xff]  ;;  %v106_v28 = vld [vmem:[%s2018_s3 + $0x28] sm:$0xff]  ;;  %vm97_vm5 = vcmask 1040384  }
   0x4   :  { %v71_v16 = vrot.slane %v1537_v15, 2  ;;  %v80_v20 = vrot.slane %v1537_v15, 1  ;;  %v121_v25 = vunpack.c.l.bf16 %v107_v23  ;;  %v122_v26 = vunpack.c.h.bf16 %v107_v23  ;;  %v105_v31 = vld [vmem:[%s2018_s3 + $0x20] sm:$0xff]  ;;  %v104_v34 = vld [vmem:[%s2018_s3 + $0x18] sm:$0xff]  ;;  %v103_v37 = vld [vmem:[%s2018_s3 + $0x10] sm:$0xff]  ;;  %s1465_s28 = smov 64  }
   0x5   :  { %137 = vmatpush.msra.mxu2 %v123_v21  ;;  %157 = vmatpush.msra.mxu3 %v124_v22  ;;  %v119_v29 = vunpack.c.l.bf16 %v106_v28  ;;  %v120_v30 = vunpack.c.h.bf16 %v106_v28  ;;  %v117_v32 = vunpack.c.l.bf16 %v105_v31  ;;  %v118_v33 = vunpack.c.h.bf16 %v105_v31  ;;  %v102_v38 = vld [vmem:[%s2018_s3 + $0x8] sm:$0xff]  ;;  %v101_v39 = vld [vmem:[%s2018_s3] sm:$0xff]  ;;  %v1368_v19 = vld [vmem:[%s2019_s4 + $0x10] sm:$0xff]   ;;  %s1114_s29 = sshll.u32 %s2022_s7, 4  ;;  %s1115_s29 = int_to_ptr.hbm [resolvable:$true] %s1114_s29 }
   0x6   :  { %v73_v18 = vmul.f32 %v71_v16, %v1522_v3  ;;  %v82_v24 = vmul.f32 %v80_v20, %v1522_v3  ;;  %v115_v35 = vunpack.c.l.bf16 %v104_v34  ;;  %v116_v36 = vunpack.c.h.bf16 %v104_v34  ;;  %v31_v49 = vld [vmem:[%s2016_s1 + $0x8] sm:$0x7] }
   0x7   :  { %138 = vmatpush.msra.mxu2 %v121_v25  ;;  %158 = vmatpush.msra.mxu3 %v122_v26  ;;  %v113_v40 = vunpack.c.l.bf16 %v103_v37  ;;  %v114_v41 = vunpack.c.h.bf16 %v103_v37  ;;  %v111_v42 = vunpack.c.l.bf16 %v102_v38  ;;  %v112_v43 = vunpack.c.h.bf16 %v102_v38  ;;  %v1367_v23 = vld [vmem:[%s2019_s4 + $0x8] sm:$0xff]  }
   0x8   :  { %v109_v45 = vunpack.c.l.bf16 %v101_v39  ;;  %v110_v46 = vunpack.c.h.bf16 %v101_v39  ;;  %v1574_v51 = vmul.f32 %v71_v16, %v31_v49  ;;  %v1576_v52 = vmul.f32 %v80_v20, %v31_v49 }
   0x9   :  { %v1409_v4 = vpop.eup %1408  ;;  %139 = vmatpush.msra.mxu2 %v119_v29  ;;  %159 = vmatpush.msra.mxu3 %v120_v30  ;;  %v89_v63 = vmul.f32 %v1537_v15, %v31_v49  ;;  %vm99_vm6 = vcmask 1041408   ;;  %vm125_vm7 = vcmask 523264   ;;  %v1218_v22 = vunpack.c.h.bf16 %v1368_v19 }
   0xa   :  { %v38_v5 = vmul.f32 64.0, %v1409_v4  ;;  %vm42_vm1 = vweird.f32 %v1409_v4  ;;  %v1540_v17 = vld [vmem:[#allocation1 + $0x1] ss:$9 sm:$0xff]  ;;  %v1214_v25 = vunpack.c.h.bf16 %v1367_v23  ;;  %v1213_v39 = vunpack.c.l.bf16 %v1367_v23 }
   0xb   :  { %75 = vst [vmem:[#allocation1] sm:$0xff] %v73_v18  ;;  %140 = vmatpush.msra.mxu2 %v117_v32  ;;  %160 = vmatpush.msra.mxu3 %v118_v33  ;;  %v1369_v18 = vld [vmem:[%s2019_s4 + $0x18] sm:$0xff]  }
   0xc   :  { %v39_v6 = vsub.f32 1.0, %v38_v5  ;;  %v1222_v20 = vunpack.c.h.bf16 %v1369_v18  ;;  %v1221_v21 = vunpack.c.l.bf16 %v1369_v18  ;;  %v342_v18 = vld [vmem:[%s2020_s5 + $0x50] sm:$0xf] }
   0xd   :  { %141 = vmatpush.msra.mxu2 %v115_v35  ;;  %161 = vmatpush.msra.mxu3 %v116_v36 }
   0xe   :  { %v40_v7 = vmul.f32 %v1409_v4, %v39_v6 }
   0xf   :  { %142 = vmatpush.msra.mxu2 %v113_v40  ;;  %162 = vmatpush.msra.mxu3 %v114_v41  ;;  %v1208_v41 = vld [vmem:[%s2019_s4] sm:$0xff]  }
  0x10   :  { %v41_v8 = vadd.f32 %v1409_v4, %v40_v7 }
  0x11   :  { %143 = vmatpush.msra.mxu2 %v111_v42  ;;  %163 = vmatpush.msra.mxu3 %v112_v43  ;;  %v1210_v42 = vunpack.c.h.bf16 %v1208_v41  ;;  %v1209_v43 = vunpack.c.l.bf16 %v1208_v41 }
  0x12   :  { %v1525_v9 = vsel %vm42_vm1, %v1409_v4, %v41_v8  ;;  %v77_v27 = vld [vmem:[#allocation1 + $0x6] ss:$9 sm:$0xff] }
  0x13   :  { %84 = vst [vmem:[#allocation1] sm:$0xff] %v82_v24  ;;  %144 = vmatpush.msra.mxu2 %v109_v45  ;;  %164 = vmatpush.msra.mxu3 %v110_v46  ;;  %v1217_v24 = vunpack.c.l.bf16 %v1368_v19 }
  0x15   :  { %247 = vmatpush.msrb.mxu2 %v1222_v20  ;;  %v365_v20 = vunpack.c.l.bf16 %v342_v18 }
  0x17   :  { %248 = vmatpush.msrb.mxu2 %v1221_v21  ;;  %v339_v21 = vld [vmem:[%s2020_s5 + $0x3c] sm:$0xff] }
  0x19   :  { %249 = vmatpush.msrb.mxu2 %v1218_v22  ;;  %v340_v22 = vld [vmem:[%s2020_s5 + $0x44] sm:$0xf] }
  0x1a   :  { %v86_v44 = vld [vmem:[#allocation1 + $0x7] ss:$9 sm:$0xff] }
  0x1b   :  { %301 = vst [vmem:[#allocation1] sm:$0xff] %v1522_v3  ;;  %250 = vmatpush.msrb.mxu2 %v1217_v24  ;;  %v360_v24 = vunpack.c.l.bf16 %v339_v21 }
  0x1d   :  { %251 = vmatpush.msrb.mxu2 %v1214_v25  ;;  %v361_v25 = vunpack.c.h.bf16 %v339_v21 }
  0x1f   :  { %252 = vmatpush.msrb.mxu2 %v1213_v39  ;;  %v331_v39 = vld [vmem:[%s2020_s5 + $0xc] sm:$0xff] }
  0x21   :  { %253 = vmatpush.msrb.mxu2 %v1210_v42 }
  0x22   :  { %v1578_v53 = vld [vmem:[#allocation1 + $0x2] ss:$9 sm:$0xff] }
  0x23   :  { %306 = vst [vmem:[#allocation1] sm:$0xff] %v1522_v3  ;;  %254 = vmatpush.msrb.mxu2 %v1209_v43  ;;  %v329_v43 = vld [vmem:[%s2020_s5] sm:$0xff] }
  0x76   :  { %v36_v10 = vpop.xlane.xlu0 %35 }
  0x77   :  { %v44_v11 = vmul.f32 %v1525_v9, %v36_v10 }
  0x79   :  { %v1529_v12 = vsub.f32 %v1515_v0, %v44_v11 }
  0x7b   :  { %v46_v13 = vmul.f32 %v1529_v12, %v1529_v12 }
  0x7d   :  { %v47_v14 = vsel %vm33_vm0, %v46_v13, 0.0 }
  0x7e   :  { %48 = vadd.xlane.f32.xlu0 %v47_v14 }
  0xf1   :  { %v49_v47 = vpop.xlane.xlu0 %48 }
  0xf2   :  { %v50_v48 = vmul.f32 %v49_v47, %v1525_v9 }
  0xf4   :  { %v51_v50 = vadd.f32 1e-05, %v50_v48 }
  0xf6   :  { %1410 = vrsqrt.f32 %v51_v50  ;;  %vm58_vm3 = vweird.f32 %v51_v50 }
  0xfc   :  { %v1411_v54 = vpop.eup %1410 }
  0xfd   :  { %v53_v55 = vmul.f32 %v1411_v54, %v51_v50  ;;  %vm59_vm2 = vweird.f32 %v1411_v54 }
  0xfe   :  { %vm60_vm4 = vmor %vm58_vm3, %vm59_vm2 }
  0xff   :  { %v54_v56 = vmul.f32 %v1411_v54, %v53_v55 }
 0x101   :  { %v55_v57 = vmul.f32 0.5, %v54_v56 }
 0x103   :  { %v56_v58 = vsub.f32 1.5, %v55_v57 }
 0x105   :  { %v57_v59 = vmul.f32 %v1411_v54, %v56_v58 }
 0x107   :  { %v61_v60 = vsel %vm60_vm4, %v1411_v54, %v57_v59 }
 0x108   :  { %v62_v61 = vmul.f32 %v61_v60, %v1529_v12 }
 0x10a   :  { %v63_v62 = vmul.f32 %v62_v61, %v1522_v3 }
 0x10c   :  { %v1585_v1 = vadd.f32 %v1540_v17, %v63_v62 }
 0x10e   :  { %v88_v2 = vadd.f32 %v86_v44, %v1585_v1  ;;  %v90_v4 = vadd.f32 %v89_v63, %v1585_v1  ;;  %v79_v5 = vadd.f32 %v77_v27, %v1585_v1 }
 0x110   :  { %v92_v6 = vperm.slane %v88_v2, 0  ;;  %v95_v7 = vperm.slane %v90_v4, 0 }
 0x112   :  { %v98_v8 = vsel %vm97_vm5, %v79_v5, %v92_v6 }
 0x113   :  { %v100_v10 = vsel %vm99_vm6, %v98_v8, %v95_v7  ;;  %v1632_v8 = vld [vmem:[#allocation1 + $0x3] ss:$9 sm:$0xff] }
 0x114   :  { %1127 = vmatmul.msk.f32.vlgmr.msra.gmra.mxu2 %vm125_vm7, %v100_v10  ;;  %1128 = vmatmul.msk.f32.vlgmr.msra.gmra.mxu3 %vm125_vm7, %v100_v10  ;;  %313 = vst [vmem:[#allocation1] sm:$0xff] %v1574_v51  ;;  %v344_v10 = vld [vmem:[%s2020_s5 + $0x5c] sm:$0xf] }
 0x11b   :  { %v1653_v23 = vld [vmem:[#allocation1 + $0x1] ss:$9 sm:$0xff] }
 0x11c   :  { %320 = vst [vmem:[#allocation1] sm:$0xff] %v1576_v52  ;;  %v336_v52 = vld [vmem:[%s2020_s5 + $0x2c] sm:$0xf] }
 0x197   :  { %v1594_v11 = vpop.f32.mrf.mxu2  ;;  %v166_v28 = vpop.f32.mrf.mxu3 }
 0x198   :  { %v169_v12 = vmul.f32 1.442695, %v1594_v11  ;;  %v171_v29 = vmul.f32 1.442695, %v166_v28  ;;  %v338_v28 = vld [vmem:[%s2020_s5 + $0x38] sm:$0xf] }
 0x19a   :  { %1412 = vpow2.f32 %v169_v12 }
 0x19b   :  { %1414 = vpow2.f32 %v171_v29 }
 0x1a0   :  { %v1597_v13 = vpop.eup %1412 }
 0x1a1   :  { %v174_v14 = vrot.slane %v1597_v13, 3  ;;  %v1415_v30 = vpop.eup %1414 }
 0x1a2   :  { %v190_v31 = vrot.slane %v1415_v30, 5  ;;  %v188_v34 = vmul.f32 %v1415_v30, %v1537_v15 }
 0x1a3   :  { %v176_v16 = vmul.f32 %v174_v14, %v1522_v3 }
 0x1a5   :  { %v178_v17 = vrot.slane %v176_v16, 4  ;;  %v192_v32 = vmul.f32 %v190_v31, %v176_v16  ;;  %v198_v37 = vrot.slane %v176_v16, 3  ;;  %v368_v16 = vunpack.c.l.bf16 %v344_v10  ;;  %v1374_v10 = vld [vmem:[%s2021_s6 + $0x28] sm:$0xff]  }
 0x1a6   :  { %v359_v31 = vunpack.c.l.bf16 %v338_v28  ;;  %v1372_v28 = vld [vmem:[%s2021_s6 + $0x18] sm:$0xff]  }
 0x1a7   :  { %179 = vrot.lane.b32.xlu1 %v178_v17, %s1465_s28  ;;  %v194_v33 = vrot.slane %v192_v32, 3  ;;  %v341_v17 = vld [vmem:[%s2020_s5 + $0x48] sm:$0xff]  ;;  %420 = vmatpush.msra.mxu1 %v368_v16 }
 0x1a8   :  { %v363_v51 = vunpack.c.l.bf16 %v341_v17  ;;  %v364_v19 = vunpack.c.h.bf16 %v341_v17  ;;  %v335_v32 = vld [vmem:[%s2020_s5 + $0x24] sm:$0xff]  ;;  %v1246_v17 = vunpack.c.h.bf16 %v1374_v10 }
 0x1a9   :  { %v196_v35 = vadd.f32 %v194_v33, %v188_v34  ;;  %421 = vmatpush.msra.mxu1 %v365_v20  ;;  %v333_v33 = vld [vmem:[%s2020_s5 + $0x18] sm:$0xff]  ;;  %v354_v34 = vunpack.c.l.bf16 %v335_v32 }
 0x1aa   :  { %v352_v41 = vunpack.c.h.bf16 %v333_v33 }
 0x1ab   :  { %v197_v36 = vadd.f32 %v196_v35, %v1537_v15  ;;  %v355_v35 = vunpack.c.h.bf16 %v335_v32 }
 0x1ad   :  { %v200_v38 = vadd.f32 %v198_v37, %v197_v36  ;;  %v356_v36 = vunpack.c.l.bf16 %v336_v52  ;;  %v351_v37 = vunpack.c.l.bf16 %v333_v33  ;;  %v1238_v33 = vunpack.c.h.bf16 %v1372_v28 }
 0x1af   :  { %v202_v40 = vrot.slane %v200_v38, 1  ;;  %v334_v38 = vld [vmem:[%s2020_s5 + $0x20] sm:$0xf] }
 0x1b0   :  { %v353_v42 = vunpack.c.l.bf16 %v334_v38 }
 0x1b1   :  { %1416 = vrcp.f32 %v202_v40  ;;  %v215_v49 = vand.u32 2147483648, %v202_v40  ;;  %vm209_vm9 = vweird.f32 %v202_v40  ;;  %v213_v50 = vand.u32 2147483647, %v202_v40 }
 0x1b3   :  { %v216_v55 = vor.u32 1.1754944e-38, %v215_v49  ;;  %vm214_vm11 = vcmp.eq.f32.partialorder %v213_v50, 8.507059e+37  ;;  %v346_v49 = vunpack.c.h.bf16 %v329_v43 }
 0x1b7   :  { %v1417_v44 = vpop.eup %1416 }
 0x1b8   :  { %v205_v45 = vmul.f32 %v1417_v44, %v202_v40  ;;  %vm210_vm8 = vweird.f32 %v1417_v44  ;;  %v332_v40 = vld [vmem:[%s2020_s5 + $0x14] sm:$0xf] }
 0x1b9   :  { %vm211_vm10 = vmor %vm209_vm9, %vm210_vm8 }
 0x1ba   :  { %v206_v46 = vsub.f32 1.0, %v205_v45  ;;  %v349_v45 = vunpack.c.h.bf16 %v331_v39 }
 0x1bc   :  { %v207_v47 = vmul.f32 %v1417_v44, %v206_v46  ;;  %v330_v46 = vld [vmem:[%s2020_s5 + $0x8] sm:$0xf] }
 0x1bd   :  { %v347_v50 = vunpack.c.l.bf16 %v330_v46 }
 0x1be   :  { %v208_v48 = vadd.f32 %v1417_v44, %v207_v47  ;;  %v350_v47 = vunpack.c.l.bf16 %v332_v40 }
 0x1c0   :  { %v212_v54 = vsel %vm211_vm10, %v1417_v44, %v208_v48  ;;  %v348_v44 = vunpack.c.l.bf16 %v331_v39  ;;  %v345_v48 = vunpack.c.l.bf16 %v329_v43  ;;  %vm567_vm10 = vcmask 1042432  }
 0x1c1   :  { %v217_v58 = vsel %vm214_vm11, %v216_v55, %v212_v54  ;;  %vm569_vm11 = vcmask 519168  }
 0x219   :  { %v180_v26 = vpop.permute.xlu1 %179 }
 0x21a   :  { %v182_v27 = vmul.f32 %v180_v26, %v1594_v11  ;;  %v362_v26 = vunpack.c.l.bf16 %v340_v22  ;;  %v1245_v22 = vunpack.c.l.bf16 %v1374_v10 }
 0x21c   :  { %184 = vrot.lane.b32.xlu1 %v182_v27, %s1465_s28  ;;  %v337_v27 = vld [vmem:[%s2020_s5 + $0x30] sm:$0xff]  ;;  %422 = vmatpush.msra.mxu1 %v362_v26 }
 0x21d   :  { %v357_v29 = vunpack.c.l.bf16 %v337_v27  ;;  %v358_v30 = vunpack.c.h.bf16 %v337_v27  ;;  %v1380_v27 = vld [vmem:[%s2021_s6 + $0x58] sm:$0xff]  }
 0x21e   :  { %423 = vmatpush.msra.mxu1 %v359_v31  ;;  %v1270_v52 = vunpack.c.h.bf16 %v1380_v27 }
 0x220   :  { %424 = vmatpush.msra.mxu1 %v356_v36  ;;  %v1269_v36 = vunpack.c.l.bf16 %v1380_v27 }
 0x222   :  { %425 = vmatpush.msra.mxu1 %v353_v42 }
 0x224   :  { %426 = vmatpush.msra.mxu1 %v350_v47 }
 0x226   :  { %427 = vmatpush.msra.mxu1 %v347_v50 }
 0x28e   :  { %v185_v56 = vpop.permute.xlu1 %184 }
 0x28f   :  { %v187_v57 = vadd.f32 %v185_v56, %v1537_v15 }
 0x291   :  { %v218_v59 = vmul.f32 %v217_v58, %v187_v57  ;;  %v1384_v57 = vld [vmem:[%s2021_s6 + $0x78] sm:$0xff]   ;;  %v1383_v58 = vld [vmem:[%s2021_s6 + $0x70] sm:$0xff]  }
 0x293   :  { %v236_v60 = vrot.slane %v218_v59, 1  ;;  %v1376_v59 = vld [vmem:[%s2021_s6 + $0x38] sm:$0xff]  }
 0x295   :  { %1129 = vmatmul.msk.f32.vlgmr.msrb.gmra.mxu2 %vm125_vm7, %v236_v60  ;;  %v1286_v60 = vunpack.c.h.bf16 %v1384_v57 }
 0x318   :  { %v256_v61 = vpop.f32.mrf.mxu2 }
 0x319   :  { %v1621_v62 = vadd.f32 %v256_v61, %v1515_v0  ;;  %v343_v0 = vld [vmem:[%s2020_s5 + $0x54] sm:$0xff]  ;;  %v1285_v61 = vunpack.c.l.bf16 %v1384_v57 }
 0x31a   :  { %v366_v12 = vunpack.c.l.bf16 %v343_v0  ;;  %v367_v14 = vunpack.c.h.bf16 %v343_v0  ;;  %v1382_v0 = vld [vmem:[%s2021_s6 + $0x68] sm:$0xff]  }
 0x31b   :  { %v279_v63 = vsel %vm33_vm0, %v1621_v62, 0.0  ;;  %v1278_v16 = vunpack.c.h.bf16 %v1382_v0  ;;  %v1277_v21 = vunpack.c.l.bf16 %v1382_v0 }
 0x31c   :  { %280 = vadd.xlane.f32.xlu2 %v279_v63  ;;  %380 = vmatpush.msrb.mxu3 %v366_v12  ;;  %v1254_v63 = vunpack.c.h.bf16 %v1376_v59  ;;  %v1281_v12 = vunpack.c.l.bf16 %v1383_v58 }
 0x31d   :  { %400 = vmatpush.msra.mxu0 %v367_v14 }
 0x31e   :  { %381 = vmatpush.msrb.mxu3 %v363_v51  ;;  %502 = vmatpush.msra.mxu2 %v1254_v63  ;;  %v1381_v51 = vld [vmem:[%s2021_s6 + $0x60] sm:$0xff]  }
 0x31f   :  { %401 = vmatpush.msra.mxu0 %v364_v19  ;;  %v1373_v19 = vld [vmem:[%s2021_s6 + $0x20] sm:$0xff]  }
 0x320   :  { %382 = vmatpush.msrb.mxu3 %v360_v24  ;;  %v1242_v26 = vunpack.c.h.bf16 %v1373_v19  ;;  %v1241_v31 = vunpack.c.l.bf16 %v1373_v19 }
 0x321   :  { %402 = vmatpush.msra.mxu0 %v361_v25  ;;  %v1274_v25 = vunpack.c.h.bf16 %v1381_v51 }
 0x322   :  { %383 = vmatpush.msrb.mxu3 %v357_v29 }
 0x323   :  { %403 = vmatpush.msra.mxu0 %v358_v30  ;;  %v1273_v30 = vunpack.c.l.bf16 %v1381_v51 }
 0x324   :  { %384 = vmatpush.msrb.mxu3 %v354_v34  ;;  %v1379_v34 = vld [vmem:[%s2021_s6 + $0x50] sm:$0xff]  }
 0x325   :  { %404 = vmatpush.msra.mxu0 %v355_v35  ;;  %v1266_v39 = vunpack.c.h.bf16 %v1379_v34  ;;  %v1265_v42 = vunpack.c.l.bf16 %v1379_v34 }
 0x326   :  { %385 = vmatpush.msrb.mxu3 %v351_v37  ;;  %v1237_v37 = vunpack.c.l.bf16 %v1372_v28 }
 0x327   :  { %405 = vmatpush.msra.mxu0 %v352_v41  ;;  %v1378_v41 = vld [vmem:[%s2021_s6 + $0x48] sm:$0xff]  }
 0x328   :  { %386 = vmatpush.msrb.mxu3 %v348_v44  ;;  %v322_v44 = vld [vmem:[#allocation1 + $0x2] ss:$9 sm:$0xff]  ;;  %v1261_v50 = vunpack.c.l.bf16 %v1378_v41 }
 0x329   :  { %406 = vmatpush.msra.mxu0 %v349_v45  ;;  %v1262_v45 = vunpack.c.h.bf16 %v1378_v41 }
 0x32a   :  { %387 = vmatpush.msrb.mxu3 %v345_v48 }
 0x32b   :  { %407 = vmatpush.msra.mxu0 %v346_v49 }
 0x32c   :  { %522 = vmatpush.msra.mxu3 %v1286_v60  ;;  %v1224_v60 = vld [vmem:[%s2021_s6] sm:$0xff]  }
 0x32d   :  { %v1225_v63 = vunpack.c.l.bf16 %v1224_v60 }
 0x32e   :  { %523 = vmatpush.msra.mxu3 %v1285_v61  ;;  %v1226_v61 = vunpack.c.h.bf16 %v1224_v60 }
 0x38f   :  { %v281_v2 = vpop.xlane.xlu2 %280 }
 0x390   :  { %v282_v4 = vmul.f32 %v281_v2, %v1525_v9  ;;  %v1375_v2 = vld [vmem:[%s2021_s6 + $0x30] sm:$0xff]  }
 0x391   :  { %v1249_v14 = vunpack.c.l.bf16 %v1375_v2 }
 0x392   :  { %v1627_v5 = vsub.f32 %v1621_v62, %v282_v4  ;;  %v1253_v4 = vunpack.c.l.bf16 %v1376_v59 }
 0x394   :  { %v284_v6 = vmul.f32 %v1627_v5, %v1627_v5  ;;  %503 = vmatpush.msra.mxu2 %v1253_v4 }
 0x396   :  { %v285_v7 = vsel %vm33_vm0, %v284_v6, 0.0  ;;  %v1282_v6 = vunpack.c.h.bf16 %v1383_v58 }
 0x397   :  { %286 = vadd.xlane.f32.xlu2 %v285_v7  ;;  %v1250_v7 = vunpack.c.h.bf16 %v1375_v2 }
 0x398   :  { %524 = vmatpush.msra.mxu3 %v1282_v6 }
 0x399   :  { %504 = vmatpush.msra.mxu2 %v1250_v7 }
 0x39a   :  { %525 = vmatpush.msra.mxu3 %v1281_v12 }
 0x39b   :  { %505 = vmatpush.msra.mxu2 %v1249_v14 }
 0x39c   :  { %526 = vmatpush.msra.mxu3 %v1278_v16 }
 0x39d   :  { %506 = vmatpush.msra.mxu2 %v1246_v17 }
 0x39e   :  { %527 = vmatpush.msra.mxu3 %v1277_v21 }
 0x39f   :  { %507 = vmatpush.msra.mxu2 %v1245_v22 }
 0x3a0   :  { %528 = vmatpush.msra.mxu3 %v1274_v25 }
 0x3a1   :  { %508 = vmatpush.msra.mxu2 %v1242_v26 }
 0x3a2   :  { %529 = vmatpush.msra.mxu3 %v1273_v30 }
 0x3a3   :  { %509 = vmatpush.msra.mxu2 %v1241_v31 }
 0x3a4   :  { %530 = vmatpush.msra.mxu3 %v1270_v52 }
 0x3a5   :  { %510 = vmatpush.msra.mxu2 %v1238_v33 }
 0x3a6   :  { %531 = vmatpush.msra.mxu3 %v1269_v36  ;;  %v1756_v36 = vld [vmem:[%s2016_s1 + $0x10] sm:$0xff] }
 0x3a7   :  { %511 = vmatpush.msra.mxu2 %v1237_v37  ;;  %600 = vst [vmem:[#allocation1] sm:$0xff] %v1756_v36 }
 0x3a8   :  { %532 = vmatpush.msra.mxu3 %v1266_v39  ;;  %v264_v39 = vrot.slane %v1594_v11, 1 }
 0x3aa   :  { %533 = vmatpush.msra.mxu3 %v1265_v42 }
 0x3ac   :  { %534 = vmatpush.msra.mxu3 %v1262_v45 }
 0x3ae   :  { %535 = vmatpush.msra.mxu3 %v1261_v50  ;;  %v1773_v42 = vld [vmem:[#allocation1 + $0x1] ss:$9 sm:$0xff] }
 0x3af   :  { %v1141_v50 = vld [vmem:[%s2018_s3 + $0x68] sm:$0xff] }
 0x40a   :  { %v287_v54 = vpop.xlane.xlu2 %286 }
 0x40b   :  { %v288_v55 = vmul.f32 %v287_v54, %v1525_v9  ;;  %v1377_v54 = vld [vmem:[%s2021_s6 + $0x40] sm:$0xff]  }
 0x40c   :  { %v1257_v58 = vunpack.c.l.bf16 %v1377_v54 }
 0x40d   :  { %v289_v56 = vadd.f32 1e-05, %v288_v55  ;;  %v1258_v55 = vunpack.c.h.bf16 %v1377_v54  ;;  %v653_v54 = vunpack.c.l.bf16 %v1141_v50 }
 0x40f   :  { %1418 = vrsqrt.f32 %v289_v56  ;;  %vm296_vm13 = vweird.f32 %v289_v56  ;;  %536 = vmatpush.msra.mxu3 %v1258_v55  ;;  %v1140_v55 = vld [vmem:[%s2018_s3 + $0x60] sm:$0xff] }
 0x411   :  { %537 = vmatpush.msra.mxu3 %v1257_v58  ;;  %v1139_v58 = vld [vmem:[%s2018_s3 + $0x58] sm:$0xff] }
 0x412   :  { %v650_v60 = vunpack.c.h.bf16 %v1139_v58 }
 0x415   :  { %v1419_v18 = vpop.eup %1418 }
 0x416   :  { %v291_v20 = vmul.f32 %v1419_v18, %v289_v56  ;;  %vm297_vm12 = vweird.f32 %v1419_v18  ;;  %v1370_v56 = vld [vmem:[%s2021_s6 + $0x8] sm:$0xff]  }
 0x417   :  { %vm298_vm14 = vmor %vm296_vm13, %vm297_vm12  ;;  %v1230_v57 = vunpack.c.h.bf16 %v1370_v56  ;;  %v1229_v59 = vunpack.c.l.bf16 %v1370_v56  ;;  %v651_v56 = vunpack.c.l.bf16 %v1140_v55 }
 0x418   :  { %v292_v24 = vmul.f32 %v1419_v18, %v291_v20 }
 0x41a   :  { %v293_v29 = vmul.f32 0.5, %v292_v24 }
 0x41c   :  { %v294_v32 = vsub.f32 1.5, %v293_v29 }
 0x41e   :  { %v295_v35 = vmul.f32 %v1419_v18, %v294_v32 }
 0x420   :  { %v299_v38 = vsel %vm298_vm14, %v1419_v18, %v295_v35 }
 0x421   :  { %v300_v40 = vmul.f32 %v299_v38, %v1627_v5 }
 0x423   :  { %v305_v43 = vmul.f32 %v1578_v53, %v300_v40  ;;  %v1371_v53 = vld [vmem:[%s2021_s6 + $0x10] sm:$0xff]   ;;  %v1770_v40 = vld [vmem:[%s2017_s2 + $0x4] sm:$0xf] }
 0x424   :  { %v606_v41 = vrot.slane %v1770_v40, 2  ;;  %v615_v11 = vrot.slane %v1770_v40, 1 }
 0x425   :  { %v1726_v46 = vadd.f32 %v1632_v8, %v305_v43  ;;  %v1234_v8 = vunpack.c.h.bf16 %v1371_v53 }
 0x426   :  { %v608_v43 = vmul.f32 %v1756_v36, %v606_v41 }
 0x427   :  { %v324_v47 = vadd.f32 %v322_v44, %v1726_v46  ;;  %v317_v5 = vadd.f32 %v1653_v23, %v1726_v46  ;;  %512 = vmatpush.msra.mxu2 %v1234_v8  ;;  %v1233_v23 = vunpack.c.l.bf16 %v1371_v53  ;;  %v1143_v44 = vld [vmem:[%s2018_s3 + $0x78] sm:$0xff] }
 0x428   :  { %610 = vst [vmem:[#allocation1] sm:$0xff] %v608_v43  ;;  %v657_v45 = vunpack.c.l.bf16 %v1143_v44 }
 0x429   :  { %v326_v48 = vperm.slane %v324_v47, 0  ;;  %513 = vmatpush.msra.mxu2 %v1233_v23  ;;  %v658_v47 = vunpack.c.h.bf16 %v1143_v44  ;;  %v654_v23 = vunpack.c.h.bf16 %v1141_v50 }
 0x42a   :  { %670 = vmatpush.msrb.mxu0 %v657_v45  ;;  %v563_v45 = vperm.slane %v1726_v46, 0 }
 0x42b   :  { %v328_v49 = vsel %vm97_vm5, %v317_v5, %v326_v48  ;;  %514 = vmatpush.msra.mxu2 %v1230_v57  ;;  %v1142_v5 = vld [vmem:[%s2018_s3 + $0x70] sm:$0xff]  ;;  %v617_v48 = vmul.f32 %v1756_v36, %v615_v11  ;;  %690 = vmatpush.msrb.mxu1 %v658_v47  ;;  %v652_v57 = vunpack.c.h.bf16 %v1140_v55  ;;  %v1388_v55 = vld [vmem:[%s2019_s4 + $0x38] sm:$0xff]  }
 0x42c   :  { %1130 = vmatmul.msk.f32.vlgmr.msrb.gmra.mxu3 %vm125_vm7, %v328_v49  ;;  %1131 = vmatmul.msk.f32.vlgmr.msra.gmra.mxu0 %vm125_vm7, %v328_v49  ;;  %v656_v53 = vunpack.c.h.bf16 %v1142_v5 }
 0x42d   :  { %1132 = vmatmul.msk.f32.vlgmr.msra.gmra.mxu1 %vm125_vm7, %v328_v49  ;;  %515 = vmatpush.msra.mxu2 %v1229_v59  ;;  %v655_v49 = vunpack.c.l.bf16 %v1142_v5  ;;  %v649_v59 = vunpack.c.l.bf16 %v1139_v58  ;;  %v1301_v58 = vunpack.c.l.bf16 %v1388_v55 }
 0x42e   :  { %691 = vmatpush.msrb.mxu1 %v656_v53 }
 0x42f   :  { %516 = vmatpush.msra.mxu2 %v1226_v61  ;;  %v1784_v8 = vld [vmem:[#allocation1 + $0x6] ss:$9 sm:$0xff]  ;;  %671 = vmatpush.msrb.mxu0 %v655_v49 }
 0x430   :  { %619 = vst [vmem:[#allocation1] sm:$0xff] %v617_v48  ;;  %692 = vmatpush.msrb.mxu1 %v654_v23  ;;  %v1138_v61 = vld [vmem:[%s2018_s3 + $0x50] sm:$0xff] }
 0x431   :  { %517 = vmatpush.msra.mxu2 %v1225_v63  ;;  %672 = vmatpush.msrb.mxu0 %v653_v54  ;;  %v647_v63 = vunpack.c.l.bf16 %v1138_v61 }
 0x432   :  { %693 = vmatpush.msrb.mxu1 %v652_v57  ;;  %v1302_v57 = vunpack.c.h.bf16 %v1388_v55 }
 0x433   :  { %673 = vmatpush.msrb.mxu0 %v651_v56  ;;  %v1387_v56 = vld [vmem:[%s2019_s4 + $0x30] sm:$0xff]  }
 0x434   :  { %694 = vmatpush.msrb.mxu1 %v650_v60  ;;  %v1386_v60 = vld [vmem:[%s2019_s4 + $0x28] sm:$0xff]  }
 0x435   :  { %674 = vmatpush.msrb.mxu0 %v649_v59  ;;  %v1298_v59 = vunpack.c.h.bf16 %v1387_v56 }
 0x437   :  { %675 = vmatpush.msrb.mxu0 %v647_v63  ;;  %v1294_v63 = vunpack.c.h.bf16 %v1386_v60 }
 0x4a9   :  { %v409_v2 = vpop.f32.mrf.mxu0 }
 0x4aa   :  { %v433_v4 = vmax.f32 %v409_v2, 0.0  ;;  %v429_v12 = vpop.f32.mrf.mxu1  ;;  %v648_v2 = vunpack.c.h.bf16 %v1138_v61  ;;  %v1297_v61 = vunpack.c.l.bf16 %v1387_v56 }
 0x4ab   :  { %v436_v14 = vmul.f32 1.442695, %v429_v12  ;;  %v1136_v12 = vld [vmem:[%s2018_s3 + $0x40] sm:$0xff] }
 0x4ac   :  { %v435_v6 = vmul.f32 %v433_v4, %v433_v4  ;;  %v621_v4 = vld [vmem:[#allocation1 + $0x7] ss:$9 sm:$0xff]  ;;  %695 = vmatpush.msrb.mxu1 %v648_v2 }
 0x4ad   :  { %1420 = vpow2.f32 %v436_v14  ;;  %835 = vst [vmem:[#allocation1] sm:$0xff] %v1756_v36 }
 0x4ae   :  { %538 = vmatmul.f32.vlgmr.msra.gmra.mxu3 %v435_v6  ;;  %v1137_v6 = vld [vmem:[%s2018_s3 + $0x48] sm:$0xff] }
 0x4af   :  { %v389_v7 = vpop.f32.mrf.mxu3 }
 0x4b0   :  { %v432_v0 = vmax.f32 %v389_v7, 0.0  ;;  %v645_v7 = vunpack.c.l.bf16 %v1137_v6 }
 0x4b2   :  { %v434_v10 = vmul.f32 %v432_v0, %v432_v0  ;;  %v646_v0 = vunpack.c.h.bf16 %v1137_v6  ;;  %676 = vmatpush.msrb.mxu0 %v645_v7 }
 0x4b3   :  { %v1421_v16 = vpop.eup %1420 }
 0x4b4   :  { %518 = vmatmul.f32.vlgmr.msra.gmra.mxu2 %v434_v10  ;;  %v542_v17 = vadd.f32 1.0, %v1421_v16  ;;  %696 = vmatpush.msrb.mxu1 %v646_v0  ;;  %v643_v16 = vunpack.c.l.bf16 %v1136_v12 }
 0x4b6   :  { %v544_v18 = vrot.slane %v542_v17, 1  ;;  %v644_v17 = vunpack.c.h.bf16 %v1136_v12  ;;  %677 = vmatpush.msrb.mxu0 %v643_v16 }
 0x4b8   :  { %1422 = vrcp.f32 %v544_v18  ;;  %v557_v24 = vand.u32 2147483648, %v544_v18  ;;  %vm551_vm1 = vweird.f32 %v544_v18  ;;  %v555_v25 = vand.u32 2147483647, %v544_v18  ;;  %697 = vmatpush.msrb.mxu1 %v644_v17  ;;  %781 = vmatpush.msra.mxu0 %v1302_v57 }
 0x4ba   :  { %v558_v29 = vor.u32 1.1754944e-38, %v557_v24  ;;  %vm556_vm3 = vcmp.eq.f32.partialorder %v555_v25, 8.507059e+37  ;;  %782 = vmatpush.msra.mxu0 %v1301_v58  ;;  %v1165_v58 = vld [vmem:[%s2020_s5 + $0x9c] sm:$0xff] }
 0x4bc   :  { %783 = vmatpush.msra.mxu0 %v1298_v59  ;;  %v1166_v59 = vld [vmem:[%s2020_s5 + $0xa4] sm:$0xf] }
 0x4be   :  { %v1423_v51 = vpop.eup %1422  ;;  %784 = vmatpush.msra.mxu0 %v1297_v61  ;;  %v895_v61 = vunpack.c.l.bf16 %v1165_v58 }
 0x4bf   :  { %v547_v19 = vmul.f32 %v1423_v51, %v544_v18  ;;  %vm552_vm15 = vweird.f32 %v1423_v51  ;;  %v1134_v18 = vld [vmem:[%s2016_s1 + $0x18] sm:$0x7] }
 0x4c0   :  { %vm553_vm2 = vmor %vm551_vm1, %vm552_vm15  ;;  %785 = vmatpush.msra.mxu0 %v1294_v63  ;;  %v896_v63 = vunpack.c.h.bf16 %v1165_v58 }
 0x4c1   :  { %v548_v20 = vsub.f32 1.0, %v547_v19  ;;  %v1809_v19 = vmul.f32 %v1134_v18, %v606_v41 }
 0x4c3   :  { %v549_v21 = vmul.f32 %v1423_v51, %v548_v20  ;;  %v1811_v20 = vmul.f32 %v1134_v18, %v615_v11 }
 0x4c5   :  { %v550_v22 = vadd.f32 %v1423_v51, %v549_v21 }
 0x4c7   :  { %v554_v26 = vsel %vm553_vm2, %v1423_v51, %v550_v22 }
 0x4c8   :  { %v559_v31 = vsel %vm556_vm3, %v558_v29, %v554_v26 }
 0x531   :  { %v539_v27 = vpop.f32.mrf.mxu3 }
 0x537   :  { %v519_v28 = vpop.f32.mrf.mxu2 }
 0x538   :  { %v540_v30 = vadd.f32 %v539_v27, %v519_v28  ;;  %v260_v28 = vrot.slane %v1522_v3, 3 }
 0x53a   :  { %v560_v32 = vmul.f32 %v559_v31, %v540_v30  ;;  %v273_v30 = vrot.slane %v1522_v3, 2 }
 0x53c   :  { %v1748_v52 = vadd.f32 %v560_v32, %v1621_v62 }
 0x53e   :  { %v576_v33 = vsel %vm33_vm0, %v1748_v52, 0.0 }
 0x53f   :  { %577 = vadd.xlane.f32.xlu0 %v576_v33 }
 0x5b2   :  { %v578_v34 = vpop.xlane.xlu0 %577 }
 0x5b3   :  { %v579_v35 = vmul.f32 %v578_v34, %v1525_v9  ;;  %v262_v34 = vmul.f32 %v260_v28, %v1537_v15 }
 0x5b5   :  { %v1760_v37 = vsub.f32 %v1748_v52, %v579_v35 }
 0x5b7   :  { %v581_v62 = vmul.f32 %v1760_v37, %v1760_v37 }
 0x5b9   :  { %v582_v38 = vsel %vm33_vm0, %v581_v62, 0.0  ;;  %v624_v62 = vmul.f32 %v1770_v40, %v1134_v18 }
 0x5ba   :  { %583 = vadd.xlane.f32.xlu1 %v582_v38  ;;  %v275_v38 = vmul.f32 %v273_v30, %v1537_v15 }
 0x5d3   :  { %265 = vrot.lane.b32.xlu1 %v264_v39, %s1465_s28  ;;  %v276_v39 = vrot.slane %v1597_v13, 6 }
 0x5d5   :  { %v278_v11 = vadd.f32 %v276_v39, %v275_v38 }
 0x62d   :  { %v584_v10 = vpop.xlane.xlu1 %583 }
 0x62e   :  { %v585_v14 = vmul.f32 %v584_v10, %v1525_v9 }
 0x630   :  { %v586_v51 = vadd.f32 1e-05, %v585_v14 }
 0x632   :  { %1424 = vrsqrt.f32 %v586_v51  ;;  %vm593_vm8 = vweird.f32 %v586_v51 }
 0x638   :  { %v1425_v21 = vpop.eup %1424 }
 0x639   :  { %v588_v22 = vmul.f32 %v1425_v21, %v586_v51  ;;  %vm594_vm4 = vweird.f32 %v1425_v21 }
 0x63a   :  { %vm595_vm9 = vmor %vm593_vm8, %vm594_vm4 }
 0x63b   :  { %v589_v24 = vmul.f32 %v1425_v21, %v588_v22  ;;  %v1293_v22 = vunpack.c.l.bf16 %v1386_v60 }
 0x63d   :  { %v590_v25 = vmul.f32 0.5, %v589_v24  ;;  %786 = vmatpush.msra.mxu0 %v1293_v22 }
 0x63f   :  { %v591_v26 = vsub.f32 1.5, %v590_v25  ;;  %v1385_v25 = vld [vmem:[%s2019_s4 + $0x20] sm:$0xff]  }
 0x641   :  { %v592_v27 = vmul.f32 %v1425_v21, %v591_v26  ;;  %v1290_v26 = vunpack.c.h.bf16 %v1385_v25 }
 0x643   :  { %v596_v29 = vsel %vm595_vm9, %v1425_v21, %v592_v27  ;;  %787 = vmatpush.msra.mxu0 %v1290_v26  ;;  %v1289_v27 = vunpack.c.l.bf16 %v1385_v25  ;;  %v1157_v25 = vld [vmem:[%s2020_s5 + $0x6c] sm:$0xff]  ;;  %v1158_v26 = vld [vmem:[%s2020_s5 + $0x74] sm:$0xf] }
 0x644   :  { %v597_v31 = vmul.f32 %v596_v29, %v1760_v37 }
 0x645   :  { %v266_v32 = vpop.permute.xlu1 %265  ;;  %788 = vmatpush.msra.mxu0 %v1289_v27  ;;  %v883_v27 = vunpack.c.l.bf16 %v1157_v25 }
 0x646   :  { %v598_v33 = vmul.f32 %v1756_v36, %v597_v31  ;;  %v268_v35 = vmul.f32 %v1597_v13, %v266_v32 }
 0x648   :  { %v1823_v41 = vadd.f32 %v1773_v42, %v598_v33  ;;  %v270_v43 = vrot.slane %v268_v35, 7 }
 0x64a   :  { %v272_v3 = vadd.f32 %v270_v43, %v262_v34  ;;  %v623_v37 = vadd.f32 %v621_v4, %v1823_v41  ;;  %v625_v44 = vadd.f32 %v624_v62, %v1823_v41  ;;  %v614_v15 = vadd.f32 %v1784_v8, %v1823_v41 }
 0x64c   :  { %v565_v47 = vsel %vm97_vm5, %v1585_v1, %v272_v3  ;;  %v627_v13 = vperm.slane %v623_v37, 0  ;;  %v630_v42 = vperm.slane %v625_v44, 0 }
 0x64d   :  { %v566_v5 = vsel %vm99_vm6, %v565_v47, %v278_v11 }
 0x64e   :  { %v568_v48 = vsel %vm567_vm10, %v566_v5, %v563_v45  ;;  %v632_v49 = vsel %vm97_vm5, %v614_v15, %v627_v13  ;;  %v1875_v15 = vld [vmem:[#allocation1 + $0x2] ss:$9 sm:$0xff] }
 0x64f   :  { %570 = vst.msk [vmem:[%s2023_s8] sm:$0xf] %vm569_vm11, %v568_v48  ;;  %v633_v46 = vsel %vm99_vm6, %v632_v49, %v630_v42 }
 0x650   :  { %1144 = vmatmul.msk.f32.vlgmr.msrb.gmra.mxu0 %vm125_vm7, %v633_v46  ;;  %1145 = vmatmul.msk.f32.vlgmr.msrb.gmra.mxu1 %vm125_vm7, %v633_v46  ;;  %840 = vst [vmem:[#allocation1] sm:$0xff] %v1756_v36  ;;  %v1169_v46 = vld [vmem:[%s2020_s5 + $0xb4] sm:$0xff] }
 0x657   :  { %v1878_v13 = vld [vmem:[#allocation1 + $0x3] ss:$9 sm:$0xff] }
 0x658   :  { %847 = vst [vmem:[#allocation1] sm:$0xff] %v1809_v19  ;;  %v1170_v19 = vld [vmem:[%s2020_s5 + $0xbc] sm:$0xf] }
 0x65f   :  { %v1906_v60 = vld [vmem:[#allocation1 + $0x1] ss:$9 sm:$0xff] }
 0x660   :  { %854 = vst [vmem:[#allocation1] sm:$0xff] %v1811_v20  ;;  %v1162_v20 = vld [vmem:[%s2020_s5 + $0x8c] sm:$0xf] }
 0x6cd   :  { %v1842_v1 = vpop.f32.mrf.mxu0  ;;  %v699_v6 = vpop.f32.mrf.mxu1 }
 0x6ce   :  { %v702_v53 = vmul.f32 1.442695, %v1842_v1  ;;  %v704_v7 = vmul.f32 1.442695, %v699_v6  ;;  %v798_v47 = vrot.slane %v1842_v1, 1 }
 0x6cf   :  { %v1164_v6 = vld [vmem:[%s2020_s5 + $0x98] sm:$0xf] }
 0x6d0   :  { %1426 = vpow2.f32 %v702_v53  ;;  %v902_v53 = vunpack.c.h.bf16 %v1169_v46 }
 0x6d1   :  { %1428 = vpow2.f32 %v704_v7 }
 0x6d2   :  { %935 = vmatpush.msrb.mxu2 %v902_v53 }
 0x6d6   :  { %v1845_v8 = vpop.eup %1426 }
 0x6d7   :  { %v707_v50 = vrot.slane %v1845_v8, 3  ;;  %v1429_v0 = vpop.eup %1428 }
 0x6d8   :  { %v723_v10 = vrot.slane %v1429_v0, 5  ;;  %v721_v16 = vmul.f32 %v1429_v0, %v1770_v40 }
 0x6d9   :  { %v709_v54 = vmul.f32 %v1756_v36, %v707_v50  ;;  %v903_v50 = vunpack.c.l.bf16 %v1170_v19 }
 0x6db   :  { %v711_v23 = vrot.slane %v709_v54, 4  ;;  %v725_v12 = vmul.f32 %v723_v10, %v709_v54  ;;  %v731_v51 = vrot.slane %v709_v54, 3  ;;  %v1167_v54 = vld [vmem:[%s2020_s5 + $0xa8] sm:$0xff]  ;;  %955 = vmatpush.msrb.mxu3 %v903_v50  ;;  %v894_v10 = vunpack.c.l.bf16 %v1164_v6  ;;  %v1393_v50 = vld [vmem:[%s2021_s6 + $0xa0] sm:$0xff]  }
 0x6dc   :  { %v898_v55 = vunpack.c.l.bf16 %v1167_v54  ;;  %v899_v56 = vunpack.c.h.bf16 %v1167_v54 }
 0x6dd   :  { %712 = vrot.lane.b32.xlu2 %v711_v23, %s1465_s28  ;;  %v727_v14 = vrot.slane %v725_v12, 3  ;;  %v1168_v23 = vld [vmem:[%s2020_s5 + $0xb0] sm:$0xf]  ;;  %v1161_v12 = vld [vmem:[%s2020_s5 + $0x84] sm:$0xff] }
 0x6de   :  { %v900_v57 = vunpack.c.l.bf16 %v1168_v23  ;;  %936 = vmatpush.msrb.mxu2 %v899_v56 }
 0x6df   :  { %v729_v17 = vadd.f32 %v727_v14, %v721_v16  ;;  %v889_v14 = vunpack.c.l.bf16 %v1161_v12  ;;  %v890_v16 = vunpack.c.h.bf16 %v1161_v12 }
 0x6e0   :  { %956 = vmatpush.msrb.mxu3 %v900_v57  ;;  %937 = vmatpush.msrb.mxu2 %v896_v63  ;;  %v1401_v57 = vld [vmem:[%s2021_s6 + $0xe0] sm:$0xff]   ;;  %v794_v63 = vrot.slane %v1756_v36, 3 }
 0x6e1   :  { %v730_v18 = vadd.f32 %v1770_v40, %v729_v17  ;;  %v891_v17 = vunpack.c.l.bf16 %v1162_v20  ;;  %v1354_v6 = vunpack.c.h.bf16 %v1401_v57  ;;  %v1353_v12 = vunpack.c.l.bf16 %v1401_v57 }
 0x6e3   :  { %v733_v21 = vadd.f32 %v731_v51, %v730_v18  ;;  %v1159_v18 = vld [vmem:[%s2020_s5 + $0x78] sm:$0xff]  ;;  %v1160_v51 = vld [vmem:[%s2020_s5 + $0x80] sm:$0xf] }
 0x6e4   :  { %v887_v22 = vunpack.c.h.bf16 %v1159_v18 }
 0x6e5   :  { %v735_v24 = vrot.slane %v733_v21, 1  ;;  %v886_v21 = vunpack.c.l.bf16 %v1159_v18  ;;  %v1391_v18 = vld [vmem:[%s2021_s6 + $0x90] sm:$0xff]  }
 0x6e7   :  { %1430 = vrcp.f32 %v735_v24  ;;  %v748_v33 = vand.u32 2147483648, %v735_v24  ;;  %vm742_vm13 = vweird.f32 %v735_v24  ;;  %v746_v34 = vand.u32 2147483647, %v735_v24 }
 0x6e9   :  { %v749_v62 = vor.u32 1.1754944e-38, %v748_v33  ;;  %vm747_vm15 = vcmp.eq.f32.partialorder %v746_v34, 8.507059e+37 }
 0x6ed   :  { %v1431_v28 = vpop.eup %1430 }
 0x6ee   :  { %v738_v29 = vmul.f32 %v1431_v28, %v735_v24  ;;  %vm743_vm12 = vweird.f32 %v1431_v28  ;;  %v888_v24 = vunpack.c.l.bf16 %v1160_v51 }
 0x6ef   :  { %vm744_vm14 = vmor %vm742_vm13, %vm743_vm12 }
 0x6f0   :  { %v739_v30 = vsub.f32 1.0, %v738_v29  ;;  %v885_v29 = vunpack.c.l.bf16 %v1158_v26 }
 0x6f2   :  { %v740_v31 = vmul.f32 %v1431_v28, %v739_v30  ;;  %v1155_v30 = vld [vmem:[%s2020_s5 + $0x60] sm:$0xff] }
 0x6f3   :  { %v880_v33 = vunpack.c.l.bf16 %v1155_v30  ;;  %v881_v34 = vunpack.c.h.bf16 %v1155_v30  ;;  %v1390_v30 = vld [vmem:[%s2021_s6 + $0x88] sm:$0xff]  }
 0x6f4   :  { %v741_v32 = vadd.f32 %v1431_v28, %v740_v31  ;;  %v1156_v31 = vld [vmem:[%s2020_s5 + $0x68] sm:$0xf] }
 0x6f6   :  { %v745_v35 = vsel %vm744_vm14, %v1431_v28, %v741_v32  ;;  %v884_v28 = vunpack.c.h.bf16 %v1157_v25 }
 0x6f7   :  { %v750_v43 = vsel %vm747_vm15, %v749_v62, %v745_v35  ;;  %v882_v35 = vunpack.c.l.bf16 %v1156_v31  ;;  %v810_v31 = vrot.slane %v1845_v8, 6 }
 0x737   :  { %v713_v2 = vpop.permute.xlu2 %712 }
 0x738   :  { %v715_v4 = vmul.f32 %v713_v2, %v1842_v1  ;;  %v901_v1 = vunpack.c.l.bf16 %v1169_v46  ;;  %v897_v2 = vunpack.c.l.bf16 %v1166_v59  ;;  %v1402_v46 = vld [vmem:[%s2021_s6 + $0xe8] sm:$0xff]  }
 0x739   :  { %v1358_v54 = vunpack.c.h.bf16 %v1402_v46  ;;  %v1357_v58 = vunpack.c.l.bf16 %v1402_v46 }
 0x73a   :  { %717 = vrot.lane.b32.xlu0 %v715_v4, %s1465_s28  ;;  %915 = vmatpush.msra.mxu1 %v901_v1  ;;  %v1163_v4 = vld [vmem:[%s2020_s5 + $0x90] sm:$0xff] }
 0x73b   :  { %v892_v7 = vunpack.c.l.bf16 %v1163_v4  ;;  %v893_v0 = vunpack.c.h.bf16 %v1163_v4  ;;  %957 = vmatpush.msrb.mxu3 %v897_v2  ;;  %v1392_v4 = vld [vmem:[%s2021_s6 + $0x98] sm:$0xff]  }
 0x73c   :  { %916 = vmatpush.msra.mxu1 %v898_v55 }
 0x73d   :  { %938 = vmatpush.msrb.mxu2 %v893_v0  ;;  %958 = vmatpush.msrb.mxu3 %v894_v10  ;;  %v1321_v0 = vunpack.c.l.bf16 %v1393_v50  ;;  %v1400_v10 = vld [vmem:[%s2021_s6 + $0xd8] sm:$0xff]  }
 0x73e   :  { %917 = vmatpush.msra.mxu1 %v895_v61  ;;  %v1322_v61 = vunpack.c.h.bf16 %v1393_v50  ;;  %v1350_v51 = vunpack.c.h.bf16 %v1400_v10  ;;  %v1349_v25 = vunpack.c.l.bf16 %v1400_v10 }
 0x73f   :  { %939 = vmatpush.msrb.mxu2 %v890_v16  ;;  %959 = vmatpush.msrb.mxu3 %v891_v17  ;;  %v796_v16 = vmul.f32 %v1770_v40, %v794_v63 }
 0x740   :  { %918 = vmatpush.msra.mxu1 %v892_v7 }
 0x741   :  { %940 = vmatpush.msrb.mxu2 %v887_v22  ;;  %960 = vmatpush.msrb.mxu3 %v888_v24  ;;  %v1317_v24 = vunpack.c.l.bf16 %v1392_v4 }
 0x742   :  { %919 = vmatpush.msra.mxu1 %v889_v14  ;;  %v1318_v14 = vunpack.c.h.bf16 %v1392_v4 }
 0x743   :  { %941 = vmatpush.msrb.mxu2 %v884_v28  ;;  %961 = vmatpush.msrb.mxu3 %v885_v29 }
 0x744   :  { %920 = vmatpush.msra.mxu1 %v886_v21  ;;  %v807_v21 = vrot.slane %v1756_v36, 2 }
 0x745   :  { %942 = vmatpush.msrb.mxu2 %v881_v34  ;;  %962 = vmatpush.msrb.mxu3 %v882_v35  ;;  %v856_v34 = vld [vmem:[#allocation1 + $0x2] ss:$9 sm:$0xff]  ;;  %v1310_v35 = vunpack.c.h.bf16 %v1390_v30 }
 0x746   :  { %921 = vmatpush.msra.mxu1 %v883_v27  ;;  %v1314_v27 = vunpack.c.h.bf16 %v1391_v18  ;;  %v809_v36 = vmul.f32 %v1770_v40, %v807_v21 }
 0x748   :  { %922 = vmatpush.msra.mxu1 %v880_v33 }
 0x7ac   :  { %v718_v38 = vpop.permute.xlu0 %717 }
 0x7ad   :  { %v720_v39 = vadd.f32 %v1770_v40, %v718_v38 }
 0x7af   :  { %v751_v3 = vmul.f32 %v750_v43, %v720_v39  ;;  %v1396_v39 = vld [vmem:[%s2021_s6 + $0xb8] sm:$0xff]   ;;  %v1395_v43 = vld [vmem:[%s2021_s6 + $0xb0] sm:$0xff]  }
 0x7b1   :  { %v770_v37 = vrot.slane %v751_v3, 1  ;;  %v1404_v3 = vld [vmem:[%s2021_s6 + $0xf8] sm:$0xff]  }
 0x7b3   :  { %1154 = vmatmul.msk.f32.vlgmr.msra.gmra.mxu0 %vm125_vm7, %v770_v37  ;;  %v1334_v37 = vunpack.c.h.bf16 %v1396_v39 }
 0x7b5   :  { %1038 = vmatpush.msrb.mxu0 %v1334_v37  ;;  %v1309_v37 = vunpack.c.l.bf16 %v1390_v30 }
 0x830   :  { %v790_v44 = vpop.f32.mrf.mxu0 }
 0x831   :  { %v1869_v11 = vadd.f32 %v790_v44, %v1748_v52  ;;  %v1333_v44 = vunpack.c.l.bf16 %v1396_v39 }
 0x833   :  { %v813_v45 = vsel %vm33_vm0, %v1869_v11, 0.0  ;;  %1039 = vmatpush.msrb.mxu0 %v1333_v44  ;;  %v1389_v44 = vld [vmem:[%s2021_s6 + $0x80] sm:$0xff]  }
 0x834   :  { %814 = vadd.xlane.f32.xlu2 %v813_v45  ;;  %v1366_v45 = vunpack.c.h.bf16 %v1404_v3 }
 0x836   :  { %1058 = vmatpush.msrb.mxu1 %v1366_v45 }
 0x84c   :  { %799 = vrot.lane.b32.xlu2 %v798_v47, %s1465_s28  ;;  %v1330_v47 = vunpack.c.h.bf16 %v1395_v43 }
 0x84e   :  { %1040 = vmatpush.msrb.mxu0 %v1330_v47  ;;  %v1398_v47 = vld [vmem:[%s2021_s6 + $0xc8] sm:$0xff]  }
 0x8a7   :  { %v815_v42 = vpop.xlane.xlu2 %814 }
 0x8a8   :  { %v816_v52 = vmul.f32 %v815_v42, %v1525_v9  ;;  %v1365_v42 = vunpack.c.l.bf16 %v1404_v3 }
 0x8aa   :  { %v1883_v5 = vsub.f32 %v1869_v11, %v816_v52  ;;  %v1394_v52 = vld [vmem:[%s2021_s6 + $0xa8] sm:$0xff]   ;;  %1059 = vmatpush.msrb.mxu1 %v1365_v42  ;;  %v1305_v42 = vunpack.c.l.bf16 %v1389_v44 }
 0x8ab   :  { %v1326_v1 = vunpack.c.h.bf16 %v1394_v52  ;;  %v1325_v56 = vunpack.c.l.bf16 %v1394_v52  ;;  %v1342_v52 = vunpack.c.h.bf16 %v1398_v47 }
 0x8ac   :  { %v818_v48 = vmul.f32 %v1883_v5, %v1883_v5 }
 0x8ae   :  { %v819_v49 = vsel %vm33_vm0, %v818_v48, 0.0 }
 0x8af   :  { %820 = vadd.xlane.f32.xlu0 %v819_v49  ;;  %v1329_v49 = vunpack.c.l.bf16 %v1395_v43  ;;  %v800_v23 = vpop.permute.xlu2 %799 }
 0x8b0   :  { %v802_v2 = vmul.f32 %v1845_v8, %v800_v23 }
 0x8b1   :  { %1041 = vmatpush.msrb.mxu0 %v1329_v49  ;;  %v1397_v49 = vld [vmem:[%s2021_s6 + $0xc0] sm:$0xff]  }
 0x8b2   :  { %v804_v17 = vrot.slane %v802_v2, 7  ;;  %v1338_v46 = vunpack.c.h.bf16 %v1397_v49 }
 0x8b3   :  { %1042 = vmatpush.msrb.mxu0 %v1326_v1 }
 0x8b4   :  { %v806_v28 = vadd.f32 %v804_v17, %v796_v16 }
 0x8b5   :  { %1043 = vmatpush.msrb.mxu0 %v1325_v56 }
 0x8b7   :  { %1044 = vmatpush.msrb.mxu0 %v1322_v61 }
 0x8b9   :  { %1045 = vmatpush.msrb.mxu0 %v1321_v0 }
 0x8bb   :  { %1046 = vmatpush.msrb.mxu0 %v1318_v14 }
 0x8bd   :  { %1047 = vmatpush.msrb.mxu0 %v1317_v24 }
 0x8bf   :  { %1048 = vmatpush.msrb.mxu0 %v1314_v27 }
 0x922   :  { %v821_v32 = vpop.xlane.xlu0 %820 }
 0x923   :  { %v822_v62 = vmul.f32 %v821_v32, %v1525_v9  ;;  %v1403_v9 = vld [vmem:[%s2021_s6 + $0xf0] sm:$0xff]   ;;  %v1313_v32 = vunpack.c.l.bf16 %v1391_v18 }
 0x924   :  { %v1362_v48 = vunpack.c.h.bf16 %v1403_v9  ;;  %v1361_v19 = vunpack.c.l.bf16 %v1403_v9  ;;  %v1306_v9 = vunpack.c.h.bf16 %v1389_v44 }
 0x925   :  { %v823_v38 = vadd.f32 1e-05, %v822_v62  ;;  %1049 = vmatpush.msrb.mxu0 %v1313_v32 }
 0x926   :  { %1060 = vmatpush.msrb.mxu1 %v1362_v48  ;;  %v1341_v48 = vunpack.c.l.bf16 %v1398_v47 }
 0x927   :  { %1432 = vrsqrt.f32 %v823_v38  ;;  %vm830_vm2 = vweird.f32 %v823_v38  ;;  %1050 = vmatpush.msrb.mxu0 %v1310_v35 }
 0x928   :  { %1061 = vmatpush.msrb.mxu1 %v1361_v19  ;;  %v1337_v19 = vunpack.c.l.bf16 %v1397_v49 }
 0x929   :  { %1051 = vmatpush.msrb.mxu0 %v1309_v37 }
 0x92a   :  { %1062 = vmatpush.msrb.mxu1 %v1358_v54 }
 0x92b   :  { %1052 = vmatpush.msrb.mxu0 %v1306_v9 }
 0x92c   :  { %1063 = vmatpush.msrb.mxu1 %v1357_v58 }
 0x92d   :  { %v1433_v53 = vpop.eup %1432  ;;  %1053 = vmatpush.msrb.mxu0 %v1305_v42 }
 0x92e   :  { %v825_v55 = vmul.f32 %v1433_v53, %v823_v38  ;;  %vm831_vm1 = vweird.f32 %v1433_v53  ;;  %1064 = vmatpush.msrb.mxu1 %v1354_v6  ;;  %v812_v38 = vadd.f32 %v810_v31, %v809_v36 }
 0x92f   :  { %vm832_vm3 = vmor %vm830_vm2, %vm831_vm1 }
 0x930   :  { %v826_v59 = vmul.f32 %v1433_v53, %v825_v55  ;;  %1065 = vmatpush.msrb.mxu1 %v1353_v12 }
 0x932   :  { %v827_v7 = vmul.f32 0.5, %v826_v59  ;;  %1066 = vmatpush.msrb.mxu1 %v1350_v51 }
 0x934   :  { %v828_v20 = vsub.f32 1.5, %v827_v7  ;;  %1067 = vmatpush.msrb.mxu1 %v1349_v25 }
 0x936   :  { %v829_v22 = vmul.f32 %v1433_v53, %v828_v20 }
 0x938   :  { %v833_v26 = vsel %vm832_vm3, %v1433_v53, %v829_v22 }
 0x939   :  { %v834_v29 = vmul.f32 %v833_v26, %v1883_v5  ;;  %v1101_v5 = vsel %vm97_vm5, %v1823_v41, %v806_v28 }
 0x93a   :  { %v1102_v40 = vsel %vm99_vm6, %v1101_v5, %v812_v38 }
 0x93b   :  { %v839_v33 = vmul.f32 %v1875_v15, %v834_v29 }
 0x93d   :  { %v844_v62 = vadd.f32 %v1878_v13, %v839_v33  ;;  %v1399_v13 = vld [vmem:[%s2021_s6 + $0xd0] sm:$0xff]   ;;  %s1466_s6 = smov [#allocation2]  }
 0x93e   :  { %v1345_v45 = vunpack.c.l.bf16 %v1399_v13  ;;  %s1112_s25 = sshll.u32 %s1466_s6, 4  ;;  %s1113_s25 = int_to_ptr.vmem [resolvable:$true] %s1112_s25 }
 0x93f   :  { %v1099_v39 = vperm.slane %v844_v62, 0  ;;  %v858_v43 = vadd.f32 %v856_v34, %v844_v62  ;;  %v851_v15 = vadd.f32 %v1906_v60, %v844_v62  ;;  %v1346_v60 = vunpack.c.h.bf16 %v1399_v13 }
 0x941   :  { %v1103_v8 = vsel %vm567_vm10, %v1102_v40, %v1099_v39  ;;  %v860_v3 = vperm.slane %v858_v43, 0  ;;  %1068 = vmatpush.msrb.mxu1 %v1346_v60 }
 0x942   :  { %1206 = vst.msk [vmem:[%s2023_s8 + $0x4] sm:$0xf] %vm569_vm11, %v1103_v8 }
 0x943   :  { %v862_v41 = vsel %vm97_vm5, %v851_v15, %v860_v3  ;;  %1069 = vmatpush.msrb.mxu1 %v1345_v45 }
 0x944   :  { %1171 = vmatmul.msk.f32.vlgmr.msra.gmra.mxu1 %vm125_vm7, %v862_v41  ;;  %1172 = vmatmul.msk.f32.vlgmr.msrb.gmra.mxu2 %vm125_vm7, %v862_v41 }
 0x945   :  { %1173 = vmatmul.msk.f32.vlgmr.msrb.gmra.mxu3 %vm125_vm7, %v862_v41  ;;  %1070 = vmatpush.msrb.mxu1 %v1342_v52 }
 0x947   :  { %1071 = vmatpush.msrb.mxu1 %v1341_v48 }
 0x949   :  { %1072 = vmatpush.msrb.mxu1 %v1338_v46 }
 0x94b   :  { %1073 = vmatpush.msrb.mxu1 %v1337_v19 }
 0x9c1   :  { %v924_v1 = vpop.f32.mrf.mxu1 }
 0x9c2   :  { %v967_v53 = vmax.f32 %v924_v1, 0.0 }
 0x9c4   :  { %v969_v50 = vmul.f32 %v967_v53, %v967_v53 }
 0x9c6   :  { %1054 = vmatmul.f32.vlgmr.msrb.gmra.mxu0 %v969_v50 }
 0x9c7   :  { %v944_v54 = vpop.f32.mrf.mxu2 }
 0x9c8   :  { %v968_v23 = vmax.f32 %v944_v54, 0.0  ;;  %v964_v56 = vpop.f32.mrf.mxu3 }
 0x9c9   :  { %v971_v57 = vmul.f32 1.442695, %v964_v56 }
 0x9ca   :  { %v970_v55 = vmul.f32 %v968_v23, %v968_v23 }
 0x9cb   :  { %1434 = vpow2.f32 %v971_v57 }
 0x9cc   :  { %1074 = vmatmul.f32.vlgmr.msrb.gmra.mxu1 %v970_v55 }
 0x9d1   :  { %v1435_v58 = vpop.eup %1434 }
 0x9d2   :  { %v1078_v59 = vadd.f32 1.0, %v1435_v58 }
 0x9d4   :  { %v1080_v61 = vrot.slane %v1078_v59, 1 }
 0x9d6   :  { %1436 = vrcp.f32 %v1080_v61  ;;  %v1093_v0 = vand.u32 2147483648, %v1080_v61  ;;  %vm1087_vm6 = vweird.f32 %v1080_v61  ;;  %v1091_v10 = vand.u32 2147483647, %v1080_v61 }
 0x9d8   :  { %v1094_v16 = vor.u32 1.1754944e-38, %v1093_v0  ;;  %vm1092_vm4 = vcmp.eq.f32.partialorder %v1091_v10, 8.507059e+37 }
 0x9dc   :  { %v1437_v63 = vpop.eup %1436 }
 0x9dd   :  { %v1083_v2 = vmul.f32 %v1437_v63, %v1080_v61  ;;  %vm1088_vm5 = vweird.f32 %v1437_v63 }
 0x9de   :  { %vm1089_vm7 = vmor %vm1087_vm6, %vm1088_vm5 }
 0x9df   :  { %v1084_v4 = vsub.f32 1.0, %v1083_v2 }
 0x9e1   :  { %v1085_v6 = vmul.f32 %v1437_v63, %v1084_v4 }
 0x9e3   :  { %v1086_v7 = vadd.f32 %v1437_v63, %v1085_v6 }
 0x9e5   :  { %v1090_v12 = vsel %vm1089_vm7, %v1437_v63, %v1086_v7 }
 0x9e6   :  { %v1095_v18 = vsel %vm1092_vm4, %v1094_v16, %v1090_v12 }
 0xa43   :  { %v1055_v20 = vpop.f32.mrf.mxu0 }
 0xa49   :  { %v1075_v14 = vpop.f32.mrf.mxu1 }
 0xa4a   :  { %v1076_v17 = vadd.f32 %v1075_v14, %v1055_v20 }
 0xa4c   :  { %v1096_v51 = vmul.f32 %v1095_v18, %v1076_v17 }
 0xa4e   :  { %v1097_v21 = vadd.f32 %v1096_v51, %v1869_v11 }
 0xa50   :  { %1106 = vst.msk [vmem:[#allocation2] sm:$0x1] %vm33_vm0, %v1097_v21 }
 0xa51   :  { %1117 = dma.vmem_to_hbm [thread:$0]  %s1113_s25, 16, %s1115_s29, [#allocation3]  }
 0xa52   :  { %1462 = dma.done.wait [#allocation3], 16  }
 0xa53   :  { %1463 = vsyncadd [#allocation3], 4294967280 }
 0xa54   :  { %1126 = vsyncpa [#allocation3], 1 }

</bundles_post_ra>
